<compile_context>
chip_gen: v5e
topology: v5e:2x2
jax: 0.10.0
libtpu: 0.0.40
codegen_flags: <defaults>
</compile_context>

<pallas_src>
import functools

import jax
import jax.numpy as jnp
from jax import lax
from jax.experimental import pallas as pl
from jax.experimental.pallas import tpu as pltpu


def _epa_fused_kernel(x_ref, wqkvv_ref, we_ref, be_ref, wf_ref, bf_ref,
                      wo1_ref, bo1_ref, wo2_ref, bo2_ref,
                      ca_scale_ref, ca_bias_ref, t2_ref,
                      out_ref, t_sc, *, num_heads):
    """Per-batch fused EPA forward, natural (N, C) layout.

    x_ref:      (1, N, C)  bf16       wqkvv_ref: (C, 4C)  bf16 (torch weight^T)
    we_ref:     (P, N) bf16           be_ref:    (P, 1)   f32
    wf_ref:     (P, N) bf16           bf_ref:    (P, 1)   f32
    wo1_ref:    (C, C//2) bf16        bo1_ref:   (1, C//2) f32
    wo2_ref:    (C, C//2) bf16        bo2_ref:   (1, C//2) f32
    ca_scale_ref/ca_bias_ref: (C, C) f32  per-row-head temperature / -1e30 mask
    t2_ref:     (1, C) f32  per-channel spatial-attn temperature (temperature2)
    out_ref:    (1, N, C) f32  final output (SA half | CA half)
    t_sc:       (d, H, N) f32 VMEM scratch == torch x_SA before reshape(B,N,C)
    """
    f32 = jnp.float32
    bf16 = jnp.bfloat16
    N = x_ref.shape[1]
    C = x_ref.shape[2]
    H = num_heads
    d = C // H
    half = C // 2

    x = x_ref[0]                                                        # (N, C) bf16
    # qkvv linear (bias-free): one (N, 4C) matmul, contraction over C.
    qkvv = jnp.dot(x, wqkvv_ref[...], preferred_element_type=f32)       # (N, 4C) f32
    q = qkvv[:, 0:C]
    k = qkvv[:, C:2 * C]
    vca = qkvv[:, 2 * C:3 * C]
    vsa = qkvv[:, 3 * C:4 * C]

    # E / F token projections for ALL heads at once (contraction over N).
    # temperature2 is constant within a head, so it is folded into kprojT via the
    # precomputed per-channel scale t2_ref (removes the per-head scalar multiply).
    kprojT = (jnp.dot(we_ref[...], k.astype(bf16), preferred_element_type=f32)
              + be_ref[...]) * t2_ref[...]                              # (P, C) f32
    vprojT = (jnp.dot(wf_ref[...], vsa.astype(bf16), preferred_element_type=f32)
              + bf_ref[...])                                            # (P, C) f32

    # torch F.normalize(dim=-1) over the token axis: max(||.||,1e-12)==sqrt(max(ss,1e-24))
    qn = q * lax.rsqrt(jnp.maximum(jnp.sum(q * q, axis=0, keepdims=True), 1e-24))
    kn = k * lax.rsqrt(jnp.maximum(jnp.sum(k * k, axis=0, keepdims=True), 1e-24))
    qn_b = qn.astype(bf16)
    kn_b = kn.astype(bf16)
    kprojT_b = kprojT.astype(bf16)
    vprojT_b = vprojT.astype(bf16)

    # ---------------- channel attention: all heads as one block-diag matmul ----------
    # s[c1,c2] = sum_n qn[n,c1]*kn[n,c2]; contract dim 0 of both (no transpose in VMEM).
    s = lax.dot_general(qn_b, kn_b, (((0,), (0,)), ((), ())),
                        preferred_element_type=f32)                     # (C, C)
    # precomputed per-(row-)head temperature on same-head blocks, -1e30 off-block;
    # applied in fp32, BEFORE the row-max subtraction.
    s = s * ca_scale_ref[...] + ca_bias_ref[...]
    s = s - jnp.max(s, axis=-1, keepdims=True)
    e = jnp.exp(s)
    attn_ca = e * pl.reciprocal(jnp.sum(e, axis=-1, keepdims=True), approx=True)
    # TODO(synk): attn_drop (Dropout) is identity here (eval-mode semantics).
    x_ca = lax.dot_general(vca.astype(bf16), attn_ca.astype(bf16),
                           (((1,), (1,)), ((), ())),
                           preferred_element_type=f32)                  # (N, C)
    # fused out_proj2 -> CA half of the output
    y_ca = jnp.dot(x_ca.astype(bf16), wo2_ref[...],
                   preferred_element_type=f32) + bo2_ref[...]           # (N, half)

    # ---------------- spatial attention (per head, statically unrolled) --------------
    for h in range(H):
        sl = slice(h * d, (h + 1) * d)
        logits = lax.dot_general(qn_b[:, sl], kprojT_b[:, sl],
                                 (((1,), (1,)), ((), ())),
                                 preferred_element_type=f32)            # (N, P)
        logits = logits - jnp.max(logits, axis=-1, keepdims=True)
        e = jnp.exp(logits)
        attn_sa = e * pl.reciprocal(jnp.sum(e, axis=-1, keepdims=True), approx=True)
        # TODO(synk): attn_drop_2 (Dropout) is identity here (eval-mode semantics).
        # z[j,n] = sum_p vprojT[p, h*d+j] * attn_sa[n, p]  (contract dim0 / dim1;
        # no explicit transpose) == torch x_SA (B,d,H,N) slice for head h.
        z = lax.dot_general(vprojT_b[:, sl], attn_sa.astype(bf16),
                            (((0,), (1,)), ((), ())),
                            preferred_element_type=f32)                 # (d, N)
        t_sc[:, h, :] = z

    # torch: x_SA.permute(0,3,1,2).reshape(B,N,C) -- a row-major scramble of (d,H,N)
    # into (N,C).  With N % C == 0 (asserted in the wrapper) it decomposes into
    # lane-dim-preserving reshapes + static lane slices only (no generic relayout).
    m = t_sc[...].reshape(C, N)                                         # merge (d,H)->C
    nc = N // C
    xsa = jnp.stack([m[:, t * C:(t + 1) * C] for t in range(nc)],
                    axis=1).reshape(N, C)                               # (C,nc,C)->(N,C)
    # fused out_proj -> SA half of the output
    y_sa = jnp.dot(xsa.astype(bf16), wo1_ref[...],
                   preferred_element_type=f32) + bo1_ref[...]           # (N, half)

    # final result: two half-width slice stores (no concat buffer).
    out_ref[0, :, 0:half] = y_sa
    out_ref[0, :, half:C] = y_ca


def epa_prepare(params, num_heads):
    """One-time parameter preprocessing (weight transposes/casts + CA mask/temps)."""
    f32 = jnp.float32
    bf16 = jnp.bfloat16
    C = params["wqkvv"].shape[1]
    H = num_heads
    d = C // H
    P = params["wE"].shape[0]
    half = C // 2

    head_of = jnp.arange(C, dtype=jnp.int32) // d                       # (C,)
    same = head_of[:, None] == head_of[None, :]                         # (C, C)
    temp_ca = params["temperature"].reshape(H).astype(f32)
    temp_sa = params["temperature2"].reshape(H).astype(f32)
    ca_scale = jnp.where(same, temp_ca[head_of][:, None], 0.0).astype(f32)   # (C, C)
    ca_bias = jnp.where(same, 0.0, -1e30).astype(f32)                        # (C, C)
    t2_vec = temp_sa[head_of].reshape(1, C).astype(f32)                      # (1, C)

    return dict(
        wqkvv_t=params["wqkvv"].T.astype(bf16),                         # (C, 4C)
        we=params["wE"].astype(bf16),                                   # (P, N)
        be=params["bE"].reshape(P, 1).astype(f32),
        wf=params["wF"].astype(bf16),                                   # (P, N)
        bf=params["bF"].reshape(P, 1).astype(f32),
        wo1_t=params["wo1"].T.astype(bf16),                             # (C, half)
        bo1=params["bo1"].reshape(1, half).astype(f32),
        wo2_t=params["wo2"].T.astype(bf16),                             # (C, half)
        bo2=params["bo2"].reshape(1, half).astype(f32),
        ca_scale=ca_scale, ca_bias=ca_bias, t2_vec=t2_vec,
    )


def epa_forward(x, prep, num_heads):
    B, N, C = x.shape
    H = num_heads
    assert C % H == 0 and C % 2 == 0
    # TODO(synk): generic-N path (N % C != 0) would need an in-kernel generic reshape.
    assert N % C == 0, "fused SA out_proj path assumes N % C == 0"
    d = C // H
    half = C // 2
    P = prep["we"].shape[0]

    kernel = functools.partial(_epa_fused_kernel, num_heads=H)
    out = pl.pallas_call(
        kernel,
        out_shape=jax.ShapeDtypeStruct((B, N, C), jnp.float32),
        grid_spec=pltpu.PrefetchScalarGridSpec(
            num_scalar_prefetch=0,
            grid=(B,),
            in_specs=[
                pl.BlockSpec((1, N, C), lambda b: (b, 0, 0)),        # x
                pl.BlockSpec((C, 4 * C), lambda b: (0, 0)),          # wqkvv^T
                pl.BlockSpec((P, N), lambda b: (0, 0)),              # wE
                pl.BlockSpec((P, 1), lambda b: (0, 0)),              # bE
                pl.BlockSpec((P, N), lambda b: (0, 0)),              # wF
                pl.BlockSpec((P, 1), lambda b: (0, 0)),              # bF
                pl.BlockSpec((C, half), lambda b: (0, 0)),           # wo1^T
                pl.BlockSpec((1, half), lambda b: (0, 0)),           # bo1
                pl.BlockSpec((C, half), lambda b: (0, 0)),           # wo2^T
                pl.BlockSpec((1, half), lambda b: (0, 0)),           # bo2
                pl.BlockSpec((C, C), lambda b: (0, 0)),              # ca_scale
                pl.BlockSpec((C, C), lambda b: (0, 0)),              # ca_bias
                pl.BlockSpec((1, C), lambda b: (0, 0)),              # t2_vec
            ],
            out_specs=pl.BlockSpec((1, N, C), lambda b: (b, 0, 0)),
            scratch_shapes=[pltpu.VMEM((d, H, N), jnp.float32)],
        ),
        compiler_params=pltpu.CompilerParams(
            dimension_semantics=("parallel",),
            vmem_limit_bytes=32 * 1024 * 1024),
    )(x.astype(jnp.bfloat16), prep["wqkvv_t"], prep["we"], prep["be"],
      prep["wf"], prep["bf"], prep["wo1_t"], prep["bo1"],
      prep["wo2_t"], prep["bo2"], prep["ca_scale"], prep["ca_bias"], prep["t2_vec"])
    return out


def epa_reference(x, params, num_heads):
    """Pure-JAX fp32 transcription of the PyTorch forward (for verification)."""
    B, N, C = x.shape
    H = num_heads
    d = C // H
    qkvv = jnp.einsum("bnc,fc->bnf", x, params["wqkvv"])
    qkvv = jnp.transpose(qkvv.reshape(B, N, 4, H, d), (2, 0, 3, 1, 4))
    q, k, v_ca, v_sa = qkvv[0], qkvv[1], qkvv[2], qkvv[3]      # (B,H,N,d)
    q = jnp.swapaxes(q, -2, -1)                                 # (B,H,d,N)
    k = jnp.swapaxes(k, -2, -1)
    v_ca = jnp.swapaxes(v_ca, -2, -1)
    v_sa = jnp.swapaxes(v_sa, -2, -1)
    k_proj = jnp.einsum("bhdn,pn->bhdp", k, params["wE"]) + params["bE"]
    v_proj = jnp.einsum("bhdn,pn->bhdp", v_sa, params["wF"]) + params["bF"]

    def _norm(t):
        return t / jnp.maximum(jnp.linalg.norm(t, axis=-1, keepdims=True), 1e-12)

    q = _norm(q)
    k = _norm(k)
    attn_ca = jnp.einsum("bhdn,bhen->bhde", q, k) * params["temperature"]
    attn_ca = jax.nn.softmax(attn_ca, axis=-1)
    x_ca = jnp.einsum("bhde,bhen->bhdn", attn_ca, v_ca)
    x_ca = jnp.transpose(x_ca, (0, 3, 1, 2)).reshape(B, N, C)
    attn_sa = jnp.einsum("bhdn,bhdp->bhnp", q, k_proj) * params["temperature2"]
    attn_sa = jax.nn.softmax(attn_sa, axis=-1)
    x_sa = jnp.einsum("bhnp,bhdp->bhnd", attn_sa, v_proj)
    x_sa = jnp.transpose(x_sa, (0, 3, 1, 2)).reshape(B, N, C)
    x_sa = x_sa @ params["wo1"].T + params["bo1"]
    x_ca = x_ca @ params["wo2"].T + params["bo2"]
    return jnp.concatenate([x_sa, x_ca], axis=-1)


if __name__ == "__main__":
    # input_size=N, hidden_size=C, proj_size=P, num_heads=H
    B, N, C, H, P = 2, 64, 32, 4, 16
    key = jax.random.PRNGKey(0)
    ks = jax.random.split(key, 10)

    def w(k, shape, scale=0.05):
        return scale * jax.random.normal(k, shape, jnp.float32)

    params = {
        "wqkvv": w(ks[0], (4 * C, C)),                       # qkvv (qkv_bias=False)
        "wE": w(ks[1], (P, N)), "bE": w(ks[2], (P,)),        # E: Linear(N, P)
        "wF": w(ks[3], (P, N)), "bF": w(ks[4], (P,)),        # F: Linear(N, P)
        "wo1": w(ks[5], (C // 2, C)), "bo1": w(ks[6], (C // 2,)),  # out_proj
        "wo2": w(ks[7], (C // 2, C)), "bo2": w(ks[8], (C // 2,)),  # out_proj2
        # nn.Parameter(torch.ones(H,1,1)); distinct deterministic values to exercise
        # the per-head broadcast.
        "temperature": (1.0 + 0.1 * jnp.arange(H, dtype=jnp.float32)).reshape(H, 1, 1),
        "temperature2": (1.0 - 0.05 * jnp.arange(H, dtype=jnp.float32)).reshape(H, 1, 1),
    }
    x = jax.random.normal(ks[9], (B, N, C), jnp.float32)

    prep = epa_prepare(params, H)                 # one-time parameter preprocessing
    out = jax.block_until_ready(epa_forward(x, prep, H))
    ref = epa_reference(x, params, H)
    assert out.shape == (B, N, C)
    max_err = float(jnp.max(jnp.abs(out - ref)))
    # bf16 MXU inputs (fp32 accumulation / fp32 softmax+normalize) => loosened tolerance.
    if max_err > 2e-2:
        raise AssertionError(f"kernel/reference mismatch, max abs err = {max_err}")
    print("KERNEL_OK")
</pallas_src>

<mosaic_0001>
module attributes {stable_mosaic.version = 11 : i64} {
  func.func @_epa_fused_kernel(%arg0: i32, %arg1: memref<1x64x32xbf16, #tpu.memory_space<vmem>>, %arg2: memref<32x128xbf16, #tpu.memory_space<vmem>>, %arg3: memref<16x64xbf16, #tpu.memory_space<vmem>>, %arg4: memref<16x1xf32, #tpu.memory_space<vmem>>, %arg5: memref<16x64xbf16, #tpu.memory_space<vmem>>, %arg6: memref<16x1xf32, #tpu.memory_space<vmem>>, %arg7: memref<32x16xbf16, #tpu.memory_space<vmem>>, %arg8: memref<1x16xf32, #tpu.memory_space<vmem>>, %arg9: memref<32x16xbf16, #tpu.memory_space<vmem>>, %arg10: memref<1x16xf32, #tpu.memory_space<vmem>>, %arg11: memref<32x32xf32, #tpu.memory_space<vmem>>, %arg12: memref<32x32xf32, #tpu.memory_space<vmem>>, %arg13: memref<1x32xf32, #tpu.memory_space<vmem>>, %arg14: memref<1x64x32xf32, #tpu.memory_space<vmem>>, %arg15: memref<8x4x64xf32, #tpu.memory_space<vmem>>) attributes {dimension_semantics = [#tpu.dimension_semantics<parallel>], iteration_bounds = array<i64: 2>, scalar_prefetch = 0 : i64, scratch_operands = 1 : i64, tpu.core_type = #tpu.core_type<tc>, window_params = [{transform_indices = @transform_0, window_bounds = array<i64: 1, 64, 32>}, {pipeline_mode = #tpu.pipeline_mode<synchronous>, transform_indices = @transform_1, window_bounds = array<i64: 32, 128>}, {pipeline_mode = #tpu.pipeline_mode<synchronous>, transform_indices = @transform_2, window_bounds = array<i64: 16, 64>}, {pipeline_mode = #tpu.pipeline_mode<synchronous>, transform_indices = @transform_3, window_bounds = array<i64: 16, 1>}, {pipeline_mode = #tpu.pipeline_mode<synchronous>, transform_indices = @transform_4, window_bounds = array<i64: 16, 64>}, {pipeline_mode = #tpu.pipeline_mode<synchronous>, transform_indices = @transform_5, window_bounds = array<i64: 16, 1>}, {pipeline_mode = #tpu.pipeline_mode<synchronous>, transform_indices = @transform_6, window_bounds = array<i64: 32, 16>}, {pipeline_mode = #tpu.pipeline_mode<synchronous>, transform_indices = @transform_7, window_bounds = array<i64: 1, 16>}, {pipeline_mode = #tpu.pipeline_mode<synchronous>, transform_indices = @transform_8, window_bounds = array<i64: 32, 16>}, {pipeline_mode = #tpu.pipeline_mode<synchronous>, transform_indices = @transform_9, window_bounds = array<i64: 1, 16>}, {pipeline_mode = #tpu.pipeline_mode<synchronous>, transform_indices = @transform_10, window_bounds = array<i64: 32, 32>}, {pipeline_mode = #tpu.pipeline_mode<synchronous>, transform_indices = @transform_11, window_bounds = array<i64: 32, 32>}, {pipeline_mode = #tpu.pipeline_mode<synchronous>, transform_indices = @transform_12, window_bounds = array<i64: 1, 32>}, {transform_indices = @transform_13, window_bounds = array<i64: 1, 64, 32>}]} {
    %c0 = arith.constant 0 : index
    %c0_0 = arith.constant 0 : index
    %c0_1 = arith.constant 0 : index
    %0 = vector.load %arg1[%c0, %c0_0, %c0_1] : memref<1x64x32xbf16, #tpu.memory_space<vmem>>, vector<1x64x32xbf16>
    %1 = vector.shape_cast %0 : vector<1x64x32xbf16> to vector<64x32xbf16>
    %c0_2 = arith.constant 0 : index
    %c0_3 = arith.constant 0 : index
    %2 = vector.load %arg2[%c0_2, %c0_3] : memref<32x128xbf16, #tpu.memory_space<vmem>>, vector<32x128xbf16>
    %cst = arith.constant dense<0.000000e+00> : vector<64x128xf32>
    %3 = tpu.matmul %1, %2, %cst {dimension_numbers = #tpu.dot_dimension_numbers<[1], [0], [0], [1], [0, 0, 1, 1], [], []>} : vector<64x32xbf16>, vector<32x128xbf16>, vector<64x128xf32> -> vector<64x128xf32>
    %4 = vector.extract_strided_slice %3 {offsets = [0, 0], sizes = [64, 32], strides = [1, 1]} : vector<64x128xf32> to vector<64x32xf32>
    %5 = vector.extract_strided_slice %3 {offsets = [0, 32], sizes = [64, 32], strides = [1, 1]} : vector<64x128xf32> to vector<64x32xf32>
    %6 = vector.extract_strided_slice %3 {offsets = [0, 64], sizes = [64, 32], strides = [1, 1]} : vector<64x128xf32> to vector<64x32xf32>
    %7 = vector.extract_strided_slice %3 {offsets = [0, 96], sizes = [64, 32], strides = [1, 1]} : vector<64x128xf32> to vector<64x32xf32>
    %c0_4 = arith.constant 0 : index
    %c0_5 = arith.constant 0 : index
    %8 = vector.load %arg3[%c0_4, %c0_5] : memref<16x64xbf16, #tpu.memory_space<vmem>>, vector<16x64xbf16>
    %9 = arith.truncf %5 : vector<64x32xf32> to vector<64x32xbf16>
    %cst_6 = arith.constant dense<0.000000e+00> : vector<16x32xf32>
    %10 = tpu.matmul %8, %9, %cst_6 {dimension_numbers = #tpu.dot_dimension_numbers<[1], [0], [0], [1], [0, 0, 1, 1], [], []>} : vector<16x64xbf16>, vector<64x32xbf16>, vector<16x32xf32> -> vector<16x32xf32>
    %c0_7 = arith.constant 0 : index
    %c0_8 = arith.constant 0 : index
    %11 = vector.load %arg4[%c0_7, %c0_8] : memref<16x1xf32, #tpu.memory_space<vmem>>, vector<16x1xf32>
    %12 = vector.broadcast %11 : vector<16x1xf32> to vector<16x32xf32>
    %13 = arith.addf %10, %12 : vector<16x32xf32>
    %c0_9 = arith.constant 0 : index
    %c0_10 = arith.constant 0 : index
    %14 = vector.load %arg13[%c0_9, %c0_10] : memref<1x32xf32, #tpu.memory_space<vmem>>, vector<1x32xf32>
    %15 = vector.broadcast %14 : vector<1x32xf32> to vector<16x32xf32>
    %16 = arith.mulf %13, %15 : vector<16x32xf32>
    %c0_11 = arith.constant 0 : index
    %c0_12 = arith.constant 0 : index
    %17 = vector.load %arg5[%c0_11, %c0_12] : memref<16x64xbf16, #tpu.memory_space<vmem>>, vector<16x64xbf16>
    %18 = arith.truncf %7 : vector<64x32xf32> to vector<64x32xbf16>
    %cst_13 = arith.constant dense<0.000000e+00> : vector<16x32xf32>
    %19 = tpu.matmul %17, %18, %cst_13 {dimension_numbers = #tpu.dot_dimension_numbers<[1], [0], [0], [1], [0, 0, 1, 1], [], []>} : vector<16x64xbf16>, vector<64x32xbf16>, vector<16x32xf32> -> vector<16x32xf32>
    %c0_14 = arith.constant 0 : index
    %c0_15 = arith.constant 0 : index
    %20 = vector.load %arg6[%c0_14, %c0_15] : memref<16x1xf32, #tpu.memory_space<vmem>>, vector<16x1xf32>
    %21 = vector.broadcast %20 : vector<16x1xf32> to vector<16x32xf32>
    %22 = arith.addf %19, %21 : vector<16x32xf32>
    %23 = arith.mulf %4, %4 : vector<64x32xf32>
    %cst_16 = arith.constant dense<0.000000e+00> : vector<32xf32>
    %24 = vector.multi_reduction <add>, %23, %cst_16 [0] : vector<64x32xf32> to vector<32xf32>
    %25 = vector.shape_cast %24 : vector<32xf32> to vector<1x32xf32>
    %cst_17 = arith.constant 1.000000e-24 : f32
    %26 = vector.broadcast %cst_17 : f32 to vector<1x32xf32>
    %27 = arith.maximumf %25, %26 : vector<1x32xf32>
    %28 = math.rsqrt %27 : vector<1x32xf32>
    %29 = vector.broadcast %28 : vector<1x32xf32> to vector<64x32xf32>
    %30 = arith.mulf %4, %29 : vector<64x32xf32>
    %31 = arith.mulf %5, %5 : vector<64x32xf32>
    %cst_18 = arith.constant dense<0.000000e+00> : vector<32xf32>
    %32 = vector.multi_reduction <add>, %31, %cst_18 [0] : vector<64x32xf32> to vector<32xf32>
    %33 = vector.shape_cast %32 : vector<32xf32> to vector<1x32xf32>
    %cst_19 = arith.constant 1.000000e-24 : f32
    %34 = vector.broadcast %cst_19 : f32 to vector<1x32xf32>
    %35 = arith.maximumf %33, %34 : vector<1x32xf32>
    %36 = math.rsqrt %35 : vector<1x32xf32>
    %37 = vector.broadcast %36 : vector<1x32xf32> to vector<64x32xf32>
    %38 = arith.mulf %5, %37 : vector<64x32xf32>
    %39 = arith.truncf %30 : vector<64x32xf32> to vector<64x32xbf16>
    %40 = arith.truncf %38 : vector<64x32xf32> to vector<64x32xbf16>
    %41 = arith.truncf %16 : vector<16x32xf32> to vector<16x32xbf16>
    %42 = arith.truncf %22 : vector<16x32xf32> to vector<16x32xbf16>
    %cst_20 = arith.constant dense<0.000000e+00> : vector<32x32xf32>
    %43 = tpu.matmul %39, %40, %cst_20 {dimension_numbers = #tpu.dot_dimension_numbers<[0], [0], [1], [1], [0, 1, 1, 1], [], []>} : vector<64x32xbf16>, vector<64x32xbf16>, vector<32x32xf32> -> vector<32x32xf32>
    %c0_21 = arith.constant 0 : index
    %c0_22 = arith.constant 0 : index
    %44 = vector.load %arg11[%c0_21, %c0_22] : memref<32x32xf32, #tpu.memory_space<vmem>>, vector<32x32xf32>
    %45 = arith.mulf %43, %44 : vector<32x32xf32>
    %c0_23 = arith.constant 0 : index
    %c0_24 = arith.constant 0 : index
    %46 = vector.load %arg12[%c0_23, %c0_24] : memref<32x32xf32, #tpu.memory_space<vmem>>, vector<32x32xf32>
    %47 = arith.addf %45, %46 : vector<32x32xf32>
    %cst_25 = arith.constant dense<0xFF800000> : vector<32xf32>
    %48 = vector.multi_reduction <maximumf>, %47, %cst_25 [1] : vector<32x32xf32> to vector<32xf32>
    %49 = vector.shape_cast %48 : vector<32xf32> to vector<32x1xf32>
    %50 = vector.broadcast %49 : vector<32x1xf32> to vector<32x32xf32>
    %51 = arith.subf %47, %50 : vector<32x32xf32>
    %52 = math.exp %51 : vector<32x32xf32>
    %cst_26 = arith.constant dense<0.000000e+00> : vector<32xf32>
    %53 = vector.multi_reduction <add>, %52, %cst_26 [1] : vector<32x32xf32> to vector<32xf32>
    %54 = vector.shape_cast %53 : vector<32xf32> to vector<32x1xf32>
    %55 = tpu.reciprocal %54 {approx = true} : vector<32x1xf32> -> vector<32x1xf32>
    %56 = vector.broadcast %55 : vector<32x1xf32> to vector<32x32xf32>
    %57 = arith.mulf %52, %56 : vector<32x32xf32>
    %58 = arith.truncf %6 : vector<64x32xf32> to vector<64x32xbf16>
    %59 = arith.truncf %57 : vector<32x32xf32> to vector<32x32xbf16>
    %cst_27 = arith.constant dense<0.000000e+00> : vector<64x32xf32>
    %60 = tpu.matmul %58, %59, %cst_27 {dimension_numbers = #tpu.dot_dimension_numbers<[1], [1], [0], [0], [0, 0, 1, 0], [], []>} : vector<64x32xbf16>, vector<32x32xbf16>, vector<64x32xf32> -> vector<64x32xf32>
    %61 = arith.truncf %60 : vector<64x32xf32> to vector<64x32xbf16>
    %c0_28 = arith.constant 0 : index
    %c0_29 = arith.constant 0 : index
    %62 = vector.load %arg9[%c0_28, %c0_29] : memref<32x16xbf16, #tpu.memory_space<vmem>>, vector<32x16xbf16>
    %cst_30 = arith.constant dense<0.000000e+00> : vector<64x16xf32>
    %63 = tpu.matmul %61, %62, %cst_30 {dimension_numbers = #tpu.dot_dimension_numbers<[1], [0], [0], [1], [0, 0, 1, 1], [], []>} : vector<64x32xbf16>, vector<32x16xbf16>, vector<64x16xf32> -> vector<64x16xf32>
    %c0_31 = arith.constant 0 : index
    %c0_32 = arith.constant 0 : index
    %64 = vector.load %arg10[%c0_31, %c0_32] : memref<1x16xf32, #tpu.memory_space<vmem>>, vector<1x16xf32>
    %65 = vector.broadcast %64 : vector<1x16xf32> to vector<64x16xf32>
    %66 = arith.addf %63, %65 : vector<64x16xf32>
    %67 = vector.extract_strided_slice %39 {offsets = [0, 0], sizes = [64, 8], strides = [1, 1]} : vector<64x32xbf16> to vector<64x8xbf16>
    %68 = vector.extract_strided_slice %41 {offsets = [0, 0], sizes = [16, 8], strides = [1, 1]} : vector<16x32xbf16> to vector<16x8xbf16>
    %cst_33 = arith.constant dense<0.000000e+00> : vector<64x16xf32>
    %69 = tpu.matmul %67, %68, %cst_33 {dimension_numbers = #tpu.dot_dimension_numbers<[1], [1], [0], [0], [0, 0, 1, 0], [], []>} : vector<64x8xbf16>, vector<16x8xbf16>, vector<64x16xf32> -> vector<64x16xf32>
    %cst_34 = arith.constant dense<0xFF800000> : vector<64xf32>
    %70 = vector.multi_reduction <maximumf>, %69, %cst_34 [1] : vector<64x16xf32> to vector<64xf32>
    %71 = vector.shape_cast %70 : vector<64xf32> to vector<64x1xf32>
    %72 = vector.broadcast %71 : vector<64x1xf32> to vector<64x16xf32>
    %73 = arith.subf %69, %72 : vector<64x16xf32>
    %74 = math.exp %73 : vector<64x16xf32>
    %cst_35 = arith.constant dense<0.000000e+00> : vector<64xf32>
    %75 = vector.multi_reduction <add>, %74, %cst_35 [1] : vector<64x16xf32> to vector<64xf32>
    %76 = vector.shape_cast %75 : vector<64xf32> to vector<64x1xf32>
    %77 = tpu.reciprocal %76 {approx = true} : vector<64x1xf32> -> vector<64x1xf32>
    %78 = vector.broadcast %77 : vector<64x1xf32> to vector<64x16xf32>
    %79 = arith.mulf %74, %78 : vector<64x16xf32>
    %80 = vector.extract_strided_slice %42 {offsets = [0, 0], sizes = [16, 8], strides = [1, 1]} : vector<16x32xbf16> to vector<16x8xbf16>
    %81 = arith.truncf %79 : vector<64x16xf32> to vector<64x16xbf16>
    %cst_36 = arith.constant dense<0.000000e+00> : vector<8x64xf32>
    %82 = tpu.matmul %80, %81, %cst_36 {dimension_numbers = #tpu.dot_dimension_numbers<[0], [1], [1], [0], [0, 1, 1, 0], [], []>} : vector<16x8xbf16>, vector<64x16xbf16>, vector<8x64xf32> -> vector<8x64xf32>
    %c0_37 = arith.constant 0 : index
    %c0_38 = arith.constant 0 : index
    %c0_39 = arith.constant 0 : index
    %83 = vector.load %arg15[%c0_37, %c0_38, %c0_39] : memref<8x4x64xf32, #tpu.memory_space<vmem>>, vector<8x1x64xf32>
    %84 = vector.shape_cast %83 : vector<8x1x64xf32> to vector<8x64xf32>
    %85 = vector.shape_cast %82 : vector<8x64xf32> to vector<8x1x64xf32>
    tpu.vector_store %arg15[%c0_37, %c0_38, %c0_39], %85 {strides = array<i32>} : memref<8x4x64xf32, #tpu.memory_space<vmem>>, vector<8x1x64xf32>,
    %86 = vector.extract_strided_slice %39 {offsets = [0, 8], sizes = [64, 8], strides = [1, 1]} : vector<64x32xbf16> to vector<64x8xbf16>
    %87 = vector.extract_strided_slice %41 {offsets = [0, 8], sizes = [16, 8], strides = [1, 1]} : vector<16x32xbf16> to vector<16x8xbf16>
    %cst_40 = arith.constant dense<0.000000e+00> : vector<64x16xf32>
    %88 = tpu.matmul %86, %87, %cst_40 {dimension_numbers = #tpu.dot_dimension_numbers<[1], [1], [0], [0], [0, 0, 1, 0], [], []>} : vector<64x8xbf16>, vector<16x8xbf16>, vector<64x16xf32> -> vector<64x16xf32>
    %cst_41 = arith.constant dense<0xFF800000> : vector<64xf32>
    %89 = vector.multi_reduction <maximumf>, %88, %cst_41 [1] : vector<64x16xf32> to vector<64xf32>
    %90 = vector.shape_cast %89 : vector<64xf32> to vector<64x1xf32>
    %91 = vector.broadcast %90 : vector<64x1xf32> to vector<64x16xf32>
    %92 = arith.subf %88, %91 : vector<64x16xf32>
    %93 = math.exp %92 : vector<64x16xf32>
    %cst_42 = arith.constant dense<0.000000e+00> : vector<64xf32>
    %94 = vector.multi_reduction <add>, %93, %cst_42 [1] : vector<64x16xf32> to vector<64xf32>
    %95 = vector.shape_cast %94 : vector<64xf32> to vector<64x1xf32>
    %96 = tpu.reciprocal %95 {approx = true} : vector<64x1xf32> -> vector<64x1xf32>
    %97 = vector.broadcast %96 : vector<64x1xf32> to vector<64x16xf32>
    %98 = arith.mulf %93, %97 : vector<64x16xf32>
    %99 = vector.extract_strided_slice %42 {offsets = [0, 8], sizes = [16, 8], strides = [1, 1]} : vector<16x32xbf16> to vector<16x8xbf16>
    %100 = arith.truncf %98 : vector<64x16xf32> to vector<64x16xbf16>
    %cst_43 = arith.constant dense<0.000000e+00> : vector<8x64xf32>
    %101 = tpu.matmul %99, %100, %cst_43 {dimension_numbers = #tpu.dot_dimension_numbers<[0], [1], [1], [0], [0, 1, 1, 0], [], []>} : vector<16x8xbf16>, vector<64x16xbf16>, vector<8x64xf32> -> vector<8x64xf32>
    %c0_44 = arith.constant 0 : index
    %c1 = arith.constant 1 : index
    %c0_45 = arith.constant 0 : index
    %102 = vector.load %arg15[%c0_44, %c1, %c0_45] : memref<8x4x64xf32, #tpu.memory_space<vmem>>, vector<8x1x64xf32>
    %103 = vector.shape_cast %102 : vector<8x1x64xf32> to vector<8x64xf32>
    %104 = vector.shape_cast %101 : vector<8x64xf32> to vector<8x1x64xf32>
    tpu.vector_store %arg15[%c0_44, %c1, %c0_45], %104 {strides = array<i32>} : memref<8x4x64xf32, #tpu.memory_space<vmem>>, vector<8x1x64xf32>,
    %105 = vector.extract_strided_slice %39 {offsets = [0, 16], sizes = [64, 8], strides = [1, 1]} : vector<64x32xbf16> to vector<64x8xbf16>
    %106 = vector.extract_strided_slice %41 {offsets = [0, 16], sizes = [16, 8], strides = [1, 1]} : vector<16x32xbf16> to vector<16x8xbf16>
    %cst_46 = arith.constant dense<0.000000e+00> : vector<64x16xf32>
    %107 = tpu.matmul %105, %106, %cst_46 {dimension_numbers = #tpu.dot_dimension_numbers<[1], [1], [0], [0], [0, 0, 1, 0], [], []>} : vector<64x8xbf16>, vector<16x8xbf16>, vector<64x16xf32> -> vector<64x16xf32>
    %cst_47 = arith.constant dense<0xFF800000> : vector<64xf32>
    %108 = vector.multi_reduction <maximumf>, %107, %cst_47 [1] : vector<64x16xf32> to vector<64xf32>
    %109 = vector.shape_cast %108 : vector<64xf32> to vector<64x1xf32>
    %110 = vector.broadcast %109 : vector<64x1xf32> to vector<64x16xf32>
    %111 = arith.subf %107, %110 : vector<64x16xf32>
    %112 = math.exp %111 : vector<64x16xf32>
    %cst_48 = arith.constant dense<0.000000e+00> : vector<64xf32>
    %113 = vector.multi_reduction <add>, %112, %cst_48 [1] : vector<64x16xf32> to vector<64xf32>
    %114 = vector.shape_cast %113 : vector<64xf32> to vector<64x1xf32>
    %115 = tpu.reciprocal %114 {approx = true} : vector<64x1xf32> -> vector<64x1xf32>
    %116 = vector.broadcast %115 : vector<64x1xf32> to vector<64x16xf32>
    %117 = arith.mulf %112, %116 : vector<64x16xf32>
    %118 = vector.extract_strided_slice %42 {offsets = [0, 16], sizes = [16, 8], strides = [1, 1]} : vector<16x32xbf16> to vector<16x8xbf16>
    %119 = arith.truncf %117 : vector<64x16xf32> to vector<64x16xbf16>
    %cst_49 = arith.constant dense<0.000000e+00> : vector<8x64xf32>
    %120 = tpu.matmul %118, %119, %cst_49 {dimension_numbers = #tpu.dot_dimension_numbers<[0], [1], [1], [0], [0, 1, 1, 0], [], []>} : vector<16x8xbf16>, vector<64x16xbf16>, vector<8x64xf32> -> vector<8x64xf32>
    %c0_50 = arith.constant 0 : index
    %c2 = arith.constant 2 : index
    %c0_51 = arith.constant 0 : index
    %121 = vector.load %arg15[%c0_50, %c2, %c0_51] : memref<8x4x64xf32, #tpu.memory_space<vmem>>, vector<8x1x64xf32>
    %122 = vector.shape_cast %121 : vector<8x1x64xf32> to vector<8x64xf32>
    %123 = vector.shape_cast %120 : vector<8x64xf32> to vector<8x1x64xf32>
    tpu.vector_store %arg15[%c0_50, %c2, %c0_51], %123 {strides = array<i32>} : memref<8x4x64xf32, #tpu.memory_space<vmem>>, vector<8x1x64xf32>,
    %124 = vector.extract_strided_slice %39 {offsets = [0, 24], sizes = [64, 8], strides = [1, 1]} : vector<64x32xbf16> to vector<64x8xbf16>
    %125 = vector.extract_strided_slice %41 {offsets = [0, 24], sizes = [16, 8], strides = [1, 1]} : vector<16x32xbf16> to vector<16x8xbf16>
    %cst_52 = arith.constant dense<0.000000e+00> : vector<64x16xf32>
    %126 = tpu.matmul %124, %125, %cst_52 {dimension_numbers = #tpu.dot_dimension_numbers<[1], [1], [0], [0], [0, 0, 1, 0], [], []>} : vector<64x8xbf16>, vector<16x8xbf16>, vector<64x16xf32> -> vector<64x16xf32>
    %cst_53 = arith.constant dense<0xFF800000> : vector<64xf32>
    %127 = vector.multi_reduction <maximumf>, %126, %cst_53 [1] : vector<64x16xf32> to vector<64xf32>
    %128 = vector.shape_cast %127 : vector<64xf32> to vector<64x1xf32>
    %129 = vector.broadcast %128 : vector<64x1xf32> to vector<64x16xf32>
    %130 = arith.subf %126, %129 : vector<64x16xf32>
    %131 = math.exp %130 : vector<64x16xf32>
    %cst_54 = arith.constant dense<0.000000e+00> : vector<64xf32>
    %132 = vector.multi_reduction <add>, %131, %cst_54 [1] : vector<64x16xf32> to vector<64xf32>
    %133 = vector.shape_cast %132 : vector<64xf32> to vector<64x1xf32>
    %134 = tpu.reciprocal %133 {approx = true} : vector<64x1xf32> -> vector<64x1xf32>
    %135 = vector.broadcast %134 : vector<64x1xf32> to vector<64x16xf32>
    %136 = arith.mulf %131, %135 : vector<64x16xf32>
    %137 = vector.extract_strided_slice %42 {offsets = [0, 24], sizes = [16, 8], strides = [1, 1]} : vector<16x32xbf16> to vector<16x8xbf16>
    %138 = arith.truncf %136 : vector<64x16xf32> to vector<64x16xbf16>
    %cst_55 = arith.constant dense<0.000000e+00> : vector<8x64xf32>
    %139 = tpu.matmul %137, %138, %cst_55 {dimension_numbers = #tpu.dot_dimension_numbers<[0], [1], [1], [0], [0, 1, 1, 0], [], []>} : vector<16x8xbf16>, vector<64x16xbf16>, vector<8x64xf32> -> vector<8x64xf32>
    %c0_56 = arith.constant 0 : index
    %c3 = arith.constant 3 : index
    %c0_57 = arith.constant 0 : index
    %140 = vector.load %arg15[%c0_56, %c3, %c0_57] : memref<8x4x64xf32, #tpu.memory_space<vmem>>, vector<8x1x64xf32>
    %141 = vector.shape_cast %140 : vector<8x1x64xf32> to vector<8x64xf32>
    %142 = vector.shape_cast %139 : vector<8x64xf32> to vector<8x1x64xf32>
    tpu.vector_store %arg15[%c0_56, %c3, %c0_57], %142 {strides = array<i32>} : memref<8x4x64xf32, #tpu.memory_space<vmem>>, vector<8x1x64xf32>,
    %c0_58 = arith.constant 0 : index
    %c0_59 = arith.constant 0 : index
    %c0_60 = arith.constant 0 : index
    %143 = vector.load %arg15[%c0_58, %c0_59, %c0_60] : memref<8x4x64xf32, #tpu.memory_space<vmem>>, vector<8x4x64xf32>
    %144 = vector.shape_cast %143 : vector<8x4x64xf32> to vector<32x64xf32>
    %145 = vector.extract_strided_slice %144 {offsets = [0, 0], sizes = [32, 32], strides = [1, 1]} : vector<32x64xf32> to vector<32x32xf32>
    %146 = vector.extract_strided_slice %144 {offsets = [0, 32], sizes = [32, 32], strides = [1, 1]} : vector<32x64xf32> to vector<32x32xf32>
    %147 = vector.shape_cast %145 : vector<32x32xf32> to vector<32x1x32xf32>
    %148 = vector.shape_cast %146 : vector<32x32xf32> to vector<32x1x32xf32>
    %149 = tpu.concatenate %147, %148 in 1 : vector<32x1x32xf32>, vector<32x1x32xf32> -> vector<32x2x32xf32>
    %150 = vector.shape_cast %149 : vector<32x2x32xf32> to vector<64x32xf32>
    %151 = arith.truncf %150 : vector<64x32xf32> to vector<64x32xbf16>
    %c0_61 = arith.constant 0 : index
    %c0_62 = arith.constant 0 : index
    %152 = vector.load %arg7[%c0_61, %c0_62] : memref<32x16xbf16, #tpu.memory_space<vmem>>, vector<32x16xbf16>
    %cst_63 = arith.constant dense<0.000000e+00> : vector<64x16xf32>
    %153 = tpu.matmul %151, %152, %cst_63 {dimension_numbers = #tpu.dot_dimension_numbers<[1], [0], [0], [1], [0, 0, 1, 1], [], []>} : vector<64x32xbf16>, vector<32x16xbf16>, vector<64x16xf32> -> vector<64x16xf32>
    %c0_64 = arith.constant 0 : index
    %c0_65 = arith.constant 0 : index
    %154 = vector.load %arg8[%c0_64, %c0_65] : memref<1x16xf32, #tpu.memory_space<vmem>>, vector<1x16xf32>
    %155 = vector.broadcast %154 : vector<1x16xf32> to vector<64x16xf32>
    %156 = arith.addf %153, %155 : vector<64x16xf32>
    %c0_66 = arith.constant 0 : index
    %c0_67 = arith.constant 0 : index
    %c0_68 = arith.constant 0 : index
    %157 = vector.load %arg14[%c0_66, %c0_67, %c0_68] : memref<1x64x32xf32, #tpu.memory_space<vmem>>, vector<1x64x16xf32>
    %158 = vector.shape_cast %157 : vector<1x64x16xf32> to vector<64x16xf32>
    %159 = vector.shape_cast %156 : vector<64x16xf32> to vector<1x64x16xf32>
    tpu.vector_store %arg14[%c0_66, %c0_67, %c0_68], %159 {strides = array<i32>} : memref<1x64x32xf32, #tpu.memory_space<vmem>>, vector<1x64x16xf32>,
    %c0_69 = arith.constant 0 : index
    %c0_70 = arith.constant 0 : index
    %c16 = arith.constant 16 : index
    %160 = vector.load %arg14[%c0_69, %c0_70, %c16] : memref<1x64x32xf32, #tpu.memory_space<vmem>>, vector<1x64x16xf32>
    %161 = vector.shape_cast %160 : vector<1x64x16xf32> to vector<64x16xf32>
    %162 = vector.shape_cast %66 : vector<64x16xf32> to vector<1x64x16xf32>
    tpu.vector_store %arg14[%c0_69, %c0_70, %c16], %162 {strides = array<i32>} : memref<1x64x32xf32, #tpu.memory_space<vmem>>, vector<1x64x16xf32>,
    return
  }
  func.func @transform_0(%arg0: i32) -> (i32, i32, i32) {
    %c0_i32 = arith.constant 0 : i32
    %c0_i32_0 = arith.constant 0 : i32
    %c0_i32_1 = arith.constant 0 : i32
    return %arg0, %c0_i32, %c0_i32_0 : i32, i32, i32
  }
  func.func @transform_1(%arg0: i32) -> (i32, i32) {
    %c0_i32 = arith.constant 0 : i32
    %c0_i32_0 = arith.constant 0 : i32
    %c0_i32_1 = arith.constant 0 : i32
    return %c0_i32, %c0_i32_0 : i32, i32
  }
  func.func @transform_2(%arg0: i32) -> (i32, i32) {
    %c0_i32 = arith.constant 0 : i32
    %c0_i32_0 = arith.constant 0 : i32
    %c0_i32_1 = arith.constant 0 : i32
    return %c0_i32, %c0_i32_0 : i32, i32
  }
  func.func @transform_3(%arg0: i32) -> (i32, i32) {
    %c0_i32 = arith.constant 0 : i32
    %c0_i32_0 = arith.constant 0 : i32
    %c0_i32_1 = arith.constant 0 : i32
    return %c0_i32, %c0_i32_0 : i32, i32
  }
  func.func @transform_4(%arg0: i32) -> (i32, i32) {
    %c0_i32 = arith.constant 0 : i32
    %c0_i32_0 = arith.constant 0 : i32
    %c0_i32_1 = arith.constant 0 : i32
    return %c0_i32, %c0_i32_0 : i32, i32
  }
  func.func @transform_5(%arg0: i32) -> (i32, i32) {
    %c0_i32 = arith.constant 0 : i32
    %c0_i32_0 = arith.constant 0 : i32
    %c0_i32_1 = arith.constant 0 : i32
    return %c0_i32, %c0_i32_0 : i32, i32
  }
  func.func @transform_6(%arg0: i32) -> (i32, i32) {
    %c0_i32 = arith.constant 0 : i32
    %c0_i32_0 = arith.constant 0 : i32
    %c0_i32_1 = arith.constant 0 : i32
    return %c0_i32, %c0_i32_0 : i32, i32
  }
  func.func @transform_7(%arg0: i32) -> (i32, i32) {
    %c0_i32 = arith.constant 0 : i32
    %c0_i32_0 = arith.constant 0 : i32
    %c0_i32_1 = arith.constant 0 : i32
    return %c0_i32, %c0_i32_0 : i32, i32
  }
  func.func @transform_8(%arg0: i32) -> (i32, i32) {
    %c0_i32 = arith.constant 0 : i32
    %c0_i32_0 = arith.constant 0 : i32
    %c0_i32_1 = arith.constant 0 : i32
    return %c0_i32, %c0_i32_0 : i32, i32
  }
  func.func @transform_9(%arg0: i32) -> (i32, i32) {
    %c0_i32 = arith.constant 0 : i32
    %c0_i32_0 = arith.constant 0 : i32
    %c0_i32_1 = arith.constant 0 : i32
    return %c0_i32, %c0_i32_0 : i32, i32
  }
  func.func @transform_10(%arg0: i32) -> (i32, i32) {
    %c0_i32 = arith.constant 0 : i32
    %c0_i32_0 = arith.constant 0 : i32
    %c0_i32_1 = arith.constant 0 : i32
    return %c0_i32, %c0_i32_0 : i32, i32
  }
  func.func @transform_11(%arg0: i32) -> (i32, i32) {
    %c0_i32 = arith.constant 0 : i32
    %c0_i32_0 = arith.constant 0 : i32
    %c0_i32_1 = arith.constant 0 : i32
    return %c0_i32, %c0_i32_0 : i32, i32
  }
  func.func @transform_12(%arg0: i32) -> (i32, i32) {
    %c0_i32 = arith.constant 0 : i32
    %c0_i32_0 = arith.constant 0 : i32
    %c0_i32_1 = arith.constant 0 : i32
    return %c0_i32, %c0_i32_0 : i32, i32
  }
  func.func @transform_13(%arg0: i32) -> (i32, i32, i32) {
    %c0_i32 = arith.constant 0 : i32
    %c0_i32_0 = arith.constant 0 : i32
    %c0_i32_1 = arith.constant 0 : i32
    return %arg0, %c0_i32, %c0_i32_0 : i32, i32, i32
  }
}

</mosaic_0001>

<bundles_post_ra>
// kernel: tpu_custom_call.1
= control target key start
LH: loop header
LB: loop body
LE: loop exit
PB: predicated region body
PF: predicated region fallthrough
CT: control target
= control target key end

     0   :  { %s2775_s25 = smov 0   ;;  %s3847_s0 = inlined_call_operand.vmem [shape: bf16[2,64,32], index: 0, kind: input, shape index: {}]   ;;  %s3848_s1 = inlined_call_operand.vmem [shape: bf16[32,128], index: 1, kind: input, shape index: {}]   ;;  %s3849_s2 = inlined_call_operand.vmem [shape: bf16[16,64], index: 2, kind: input, shape index: {}]   ;;  %s3850_s3 = inlined_call_operand.vmem [shape: f32[16,1], index: 3, kind: input, shape index: {}]   ;;  %s3851_s4 = inlined_call_operand.vmem [shape: bf16[16,64], index: 4, kind: input, shape index: {}]   ;;  %s3852_s5 = inlined_call_operand.vmem [shape: f32[16,1], index: 5, kind: input, shape index: {}]   ;;  %s3853_s6 = inlined_call_operand.vmem [shape: bf16[32,16], index: 6, kind: input, shape index: {}]   ;;  %s3854_s7 = inlined_call_operand.vmem [shape: f32[1,16], index: 7, kind: input, shape index: {}]   ;;  %s3855_s8 = inlined_call_operand.vmem [shape: bf16[32,16], index: 8, kind: input, shape index: {}]   ;;  %s3856_s9 = inlined_call_operand.vmem [shape: f32[1,16], index: 9, kind: input, shape index: {}]   ;;  %s3857_s10 = inlined_call_operand.vmem [shape: f32[32,32], index: 10, kind: input, shape index: {}]   ;;  %s3858_s11 = inlined_call_operand.vmem [shape: f32[32,32], index: 11, kind: input, shape index: {}]   ;;  %s3859_s12 = inlined_call_operand.vmem [shape: f32[1,32], index: 12, kind: input, shape index: {}]   ;;  %s3860_s13 = inlined_call_operand.vmem [shape: f32[2,64,32], index: 13, kind: output, shape index: {}]  }
   0x1 LB: > { %s2404_s26 = sadd.s32 4294967295, %s2695_s25   ;;  %p2408_p0 = scmp.ge.s32.totalorder %s2695_s25, 1  ;;  %s2695_s25 = sphi %s2775_s25, %s23_s25  }
   0x2   : > { %p387_p1 = scmp.lt.s32.totalorder %s2695_s25, 3 }
   0x4   : > { %p388_p2 = pnand %p2408_p0, %p387_p1 }
   0x5   : > { %p431_p3 = scmp.lt.s32.totalorder (!%p388_p2), %s2404_s26, 1  ;;  %s2697_s18 = smov (!%p388_p2), 96  }
   0x6   : > { %391 = sbr.rel (%p388_p2) target bundleno = 2788 (0xae4), region = 72  ;;  %s2699_s23 = smov (!%p388_p2), 32  }
   0x7   : > { %s2700_s24 = smov (!%p388_p2), 120   ;;  %s2702_s30 = smov (!%p388_p2), 112  }
   0xb   : > { %v2510_v0 = vld [vmem:[%s3848_s1 + $0x8] sm:$0xff]  ;;  %v2509_v1 = vld [vmem:[%s3848_s1] sm:$0xff]  ;;  %s3862_s26 = smov (!%p431_p3, %s2404_s26), 1  ;;  %vm486_vm0 = vcmask 261120   ;;  %vm687_vm1 = vcmask 523520   ;;  %v2698_v57 = vmov 0  }
   0xc   : > { %505 = vmatpush.bf16.msra.mxu0 %v2510_v0  ;;  %2517 = vmatpush.bf16.msra.mxu2 %v2510_v0  ;;  %s2503_s14 = sshll.u32 %s3862_s26, 5  ;;  %vm567_vm8 = vcmask 523264   ;;  %vm1012_vm9 = vcmask 64512   ;;  %vm1057_vm10 = vcmask 130048   ;;  %vm1215_vm11 = vcmask 516096  }
   0xd   : > { %s435_s17 = scalar_lea.vmem %s3847_s0, %s2503_s14  ;;  %2536 = vset.pattern.permute.xlu0 %v2698_v57  ;;  %2535 = vset.pattern.permute.xlu2 %v2698_v57  ;;  %s2703_s14 = smov 104   ;;  %vm1896_vm12 = vcmask 1040384   ;;  %vm1898_vm13 = vcmask 1041409   ;;  %vm1901_vm14 = vcmask 1042434   ;;  %vm1904_vm15 = vcmask 1043459  }
   0xe   : > { %v2505_v2 = vld [vmem:[%s435_s17] sm:$0xff]  ;;  %v2507_v3 = vld [vmem:[%s435_s17 + $0x10] sm:$0xff]  ;;  %v2506_v4 = vld [vmem:[%s435_s17 + $0x8] sm:$0xff] }
   0xf   : > { %v2508_v5 = vld [vmem:[%s435_s17 + $0x18] sm:$0xff]  ;;  %s2704_s17 = smov 16  }
  0x10   : > { %506 = vmatpush.bf16.msra.mxu0 %v2509_v1  ;;  %2518 = vmatpush.bf16.msra.mxu2 %v2509_v1 }
  0x13   : > { %2437 = vmatmul.msk.bf16.vlgmr.msra.gmra.mxu0 %vm486_vm0, %v2505_v2  ;;  %2439 = vmatmul.msk.bf16.vlgmr.msra.gmra.mxu2 %vm486_vm0, %v2507_v3 }
  0x23   : > { %2438 = vmatmul.msk.bf16.gmra.mxu0 %vm486_vm0, %v2506_v4  ;;  %2440 = vmatmul.msk.bf16.gmra.mxu2 %vm486_vm0, %v2508_v5 }
  0x90   : > { %v2799_v6 = vpop.f32.mrf.mxu0 }
  0x91   : > { %v639_v12 = vmul.f32 %v2799_v6, %v2799_v6 }
  0x93   : > { %v688_v16 = vsel %vm687_vm1, %v639_v12, 0.0  ;;  %v647_v28 = vsel %vm486_vm0, %v639_v12, 0.0 }
  0x96   : > { %v2801_v7 = vpop.f32.mrf.mxu2 }
  0x97   : > { %v643_v20 = vmul.f32 %v2801_v7, %v2801_v7 }
  0x98   : > { %v2803_v8 = vpop.f32.mrf.mxu0 }
  0x99   : > { %v640_v11 = vmul.f32 %v2803_v8, %v2803_v8  ;;  %v695_v29 = vsel %vm687_vm1, %v643_v20, 0.0  ;;  %v2856_v42 = vpack.c.bf16 %v2803_v8, %v2799_v6  ;;  %v654_v47 = vsel %vm486_vm0, %v643_v20, 0.0 }
  0x9b   : > { %v689_v14 = vsel %vm687_vm1, %v640_v11, 0.0  ;;  %v648_v24 = vsel %vm486_vm0, %v640_v11, 0.0 }
  0x9c   : > { %v690_v18 = vadd.f32 %v689_v14, %v688_v16  ;;  %v649_v32 = vadd.f32 %v648_v24, %v647_v28 }
  0x9e   : > { %v2805_v9 = vpop.f32.mrf.mxu2 }
  0x9f   : > { %v644_v25 = vmul.f32 %v2805_v9, %v2805_v9  ;;  %v2864_v50 = vpack.c.bf16 %v2805_v9, %v2801_v7 }
  0xa0   : > { %v2807_v10 = vpop.f32.mrf.mxu0 }
  0xa1   : > { %v641_v13 = vmul.f32 %v2807_v10, %v2807_v10  ;;  %v697_v35 = vsel %vm687_vm1, %v644_v25, 0.0  ;;  %v656_v52 = vsel %vm486_vm0, %v644_v25, 0.0 }
  0xa3   : > { %v691_v17 = vsel %vm687_vm1, %v641_v13, 0.0  ;;  %v650_v30 = vsel %vm486_vm0, %v641_v13, 0.0 }
  0xa4   : > { %v692_v23 = vadd.f32 %v691_v17, %v690_v18  ;;  %v651_v39 = vadd.f32 %v650_v30, %v649_v32 }
  0xa6   : > { %v2816_v15 = vpop.f32.mrf.mxu2 }
  0xa7   : > { %v645_v31 = vmul.f32 %v2816_v15, %v2816_v15 }
  0xa8   : > { %v2820_v19 = vpop.f32.mrf.mxu0 }
  0xa9   : > { %v642_v21 = vmul.f32 %v2820_v19, %v2820_v19  ;;  %v2828_v22 = vpack.c.bf16 %v2820_v19, %v2807_v10  ;;  %v699_v41 = vsel %vm687_vm1, %v645_v31, 0.0  ;;  %v658_v56 = vsel %vm486_vm0, %v645_v31, 0.0 }
  0xab   : > { %v693_v26 = vsel %vm687_vm1, %v642_v21, 0.0  ;;  %557 = vrot.lane.b32.xlu1 %v2828_v22, %s2697_s18  ;;  %v652_v36 = vsel %vm486_vm0, %v642_v21, 0.0 }
  0xac   : > { %v694_v27 = vadd.f32 %v693_v26, %v692_v23  ;;  %v653_v43 = vadd.f32 %v652_v36, %v651_v39  ;;  %v534_v36 = vld [vmem:[%s3850_s3] sm:$0xff] }
  0xae   : > { %v696_v33 = vadd.f32 %v695_v29, %v694_v27  ;;  %v2841_v34 = vpop.f32.mrf.mxu2  ;;  %v655_v48 = vadd.f32 %v654_v47, %v653_v43 }
  0xaf   : > { %v646_v37 = vmul.f32 %v2841_v34, %v2841_v34  ;;  %v2849_v38 = vpack.c.bf16 %v2841_v34, %v2816_v15 }
  0xb0   : > { %v698_v40 = vadd.f32 %v697_v35, %v696_v33  ;;  %v657_v53 = vadd.f32 %v656_v52, %v655_v48  ;;  %v535_v33 = vld [vmem:[%s3850_s3 + $0x8] sm:$0xff] }
  0xb1   : > { %561 = vrot.lane.b32.xlu0 %v2849_v38, %s2697_s18  ;;  %v701_v45 = vsel %vm687_vm1, %v646_v37, 0.0  ;;  %v660_v61 = vsel %vm486_vm0, %v646_v37, 0.0  ;;  %vm2340_vm1 = vcmask 261248  }
  0xb2   : > { %v700_v44 = vadd.f32 %v699_v41, %v698_v40  ;;  %v659_v58 = vadd.f32 %v658_v56, %v657_v53 }
  0xb3   : > { %555 = vrot.lane.b32.xlu1 %v2856_v42, %s2697_s18 }
  0xb4   : > { %v702_v46 = vadd.f32 %v701_v45, %v700_v44  ;;  %v661_v62 = vadd.f32 %v660_v61, %v659_v58 }
  0xb6   : > { %v703_v49 = vrot.slane %v702_v46, 4  ;;  %v662_v0 = vrot.slane %v661_v62, 4 }
  0xb8   : > { %v704_v51 = vadd.f32 %v703_v49, %v702_v46  ;;  %v663_v1 = vadd.f32 %v662_v0, %v661_v62 }
  0xb9   : > { %559 = vrot.lane.b32.xlu0 %v2864_v50, %s2697_s18 }
  0xba   : > { %v705_v54 = vrot.slane %v704_v51, 2  ;;  %v664_v4 = vrot.slane %v663_v1, 2 }
  0xbc   : > { %v706_v55 = vadd.f32 %v705_v54, %v704_v51  ;;  %v665_v12 = vadd.f32 %v664_v4, %v663_v1 }
  0xbe   : > { %v707_v59 = vrot.slane %v706_v55, 1  ;;  %v666_v16 = vrot.slane %v665_v12, 1 }
  0xc0   : > { %v708_v60 = vadd.f32 %v707_v59, %v706_v55  ;;  %v667_v29 = vadd.f32 %v666_v16, %v665_v12 }
  0xc2   : > { %v709_v63 = vmax.f32 %v708_v60, 1e-24  ;;  %v668_v32 = vmax.f32 %v667_v29, 1e-24  ;;  %v2538_v29 = vld [vmem:[%s3859_s12] ss:$0 sm:$0xff] }
  0xc4   : > { %2541 = vrsqrt.f32 %v709_v63  ;;  %vm716_vm3 = vweird.f32 %v709_v63  ;;  %vm675_vm6 = vweird.f32 %v668_v32 }
  0xc5   : > { %2543 = vrsqrt.f32 %v668_v32 }
  0xca   : > { %v2542_v2 = vpop.eup %2541 }
  0xcb   : > { %v711_v3 = vmul.f32 %v2542_v2, %v709_v63  ;;  %vm717_vm2 = vweird.f32 %v2542_v2  ;;  %v2544_v37 = vpop.eup %2543 }
  0xcc   : > { %vm718_vm4 = vmor %vm716_vm3, %vm717_vm2  ;;  %v670_v39 = vmul.f32 %v2544_v37, %v668_v32  ;;  %vm676_vm5 = vweird.f32 %v2544_v37 }
  0xcd   : > { %v712_v5 = vmul.f32 %v2542_v2, %v711_v3  ;;  %vm677_vm7 = vmor %vm675_vm6, %vm676_vm5 }
  0xce   : > { %v671_v40 = vmul.f32 %v2544_v37, %v670_v39 }
  0xcf   : > { %v713_v11 = vmul.f32 0.5, %v712_v5 }
  0xd0   : > { %v672_v41 = vmul.f32 0.5, %v671_v40 }
  0xd1   : > { %v714_v13 = vsub.f32 1.5, %v713_v11 }
  0xd2   : > { %v673_v43 = vsub.f32 1.5, %v672_v41 }
  0xd3   : > { %v715_v14 = vmul.f32 %v2542_v2, %v714_v13 }
  0xd4   : > { %v674_v44 = vmul.f32 %v2544_v37, %v673_v43 }
  0xd5   : > { %v719_v17 = vsel %vm718_vm4, %v2542_v2, %v715_v14 }
  0xd6   : > { %v726_v18 = vmul.f32 %v719_v17, %v2816_v15  ;;  %v727_v20 = vmul.f32 %v719_v17, %v2841_v34  ;;  %v722_v21 = vmul.f32 %v719_v17, %v2807_v10  ;;  %v723_v23 = vmul.f32 %v719_v17, %v2820_v19 }
  0xd7   : > { %v720_v24 = vmul.f32 %v719_v17, %v2799_v6  ;;  %v721_v25 = vmul.f32 %v719_v17, %v2803_v8  ;;  %v724_v30 = vmul.f32 %v719_v17, %v2801_v7  ;;  %v725_v31 = vmul.f32 %v719_v17, %v2805_v9 }
  0xd8   : > { %v739_v26 = vpack.c.bf16 %v727_v20, %v726_v18  ;;  %v737_v27 = vpack.c.bf16 %v723_v23, %v722_v21  ;;  %v678_v45 = vsel %vm677_vm7, %v2544_v37, %v674_v44  ;;  %v593_v44 = vld [vmem:[%s3852_s5] sm:$0xff] }
  0xd9   : > { %v736_v28 = vpack.c.bf16 %v721_v25, %v720_v24  ;;  %v738_v35 = vpack.c.bf16 %v725_v31, %v724_v30  ;;  %v679_v46 = vmul.f32 %v678_v45, %v2799_v6  ;;  %v680_v47 = vmul.f32 %v678_v45, %v2803_v8 }
  0xda   : > { %794 = vrot.lane.b32.xlu2 %v739_v26, %s2697_s18  ;;  %790 = vrot.lane.b32.xlu0 %v737_v27, %s2697_s18  ;;  %v681_v54 = vmul.f32 %v678_v45, %v2807_v10  ;;  %v682_v55 = vmul.f32 %v678_v45, %v2820_v19  ;;  %v683_v8 = vmul.f32 %v678_v45, %v2801_v7 }
  0xdb   : > { %788 = vrot.lane.b32.xlu1 %v736_v28, %s2697_s18  ;;  %v728_v48 = vpack.c.bf16 %v679_v46, %v679_v46  ;;  %v729_v49 = vpack.c.bf16 %v680_v47, %v680_v47  ;;  %v684_v62 = vmul.f32 %v678_v45, %v2805_v9  ;;  %v685_v4 = vmul.f32 %v678_v45, %v2816_v15  ;;  %v2511_v9 = vld [vmem:[%s3849_s2] sm:$0xff]  ;;  %v827_v47 = vld [vmem:[%s3857_s10 + $0x10] sm:$0xff] }
  0xdc   : > { %v730_v56 = vpack.c.bf16 %v681_v54, %v681_v54  ;;  %v731_v58 = vpack.c.bf16 %v682_v55, %v682_v55  ;;  %v732_v63 = vpack.c.bf16 %v683_v8, %v683_v8  ;;  %v686_v5 = vmul.f32 %v678_v45, %v2841_v34 }
  0xdd   : > { %v752_v51 = vunpack.c.l.b16 %v728_v48  ;;  %v753_v52 = vunpack.c.l.b16 %v729_v49  ;;  %v733_v0 = vpack.c.bf16 %v684_v62, %v684_v62  ;;  %v734_v12 = vpack.c.bf16 %v685_v4, %v685_v4  ;;  %v835_v49 = vld [vmem:[%s3858_s11 + $0x10] sm:$0xff] }
  0xde   : > { %v754_v59 = vunpack.c.l.b16 %v730_v56  ;;  %v755_v60 = vunpack.c.l.b16 %v731_v58  ;;  %v756_v2 = vunpack.c.l.b16 %v732_v63  ;;  %v735_v13 = vpack.c.bf16 %v686_v5, %v686_v5  ;;  %v834_v58 = vld [vmem:[%s3858_s11 + $0x8] sm:$0xff] }
  0xdf   : > { %v2897_v53 = vpack.c.b16 %v753_v52, %v752_v51  ;;  %v757_v19 = vunpack.c.l.b16 %v733_v0  ;;  %v758_v14 = vunpack.c.l.b16 %v734_v12  ;;  %v826_v52 = vld [vmem:[%s3857_s10 + $0x8] sm:$0xff] }
  0xe0   : > { %v2902_v61 = vpack.c.b16 %v755_v60, %v754_v59  ;;  %v759_v16 = vunpack.c.l.b16 %v735_v13 }
  0xe1   : > { %v2907_v3 = vpack.c.b16 %v757_v19, %v756_v2 }
  0xe2   : > { %792 = vrot.lane.b32.xlu2 %v738_v35, %s2697_s18  ;;  %543 = vperm.xlu0 %2536, %v535_v33   ;;  %v2916_v15 = vpack.c.b16 %v759_v16, %v758_v14 }
  0xea   : > { %538 = vperm.xlu2 %2535, %v534_v36   ;;  %612 = vrot.lane.b32.xlu0 %v2828_v22, %s2699_s23 }
  0xf2   : > { %616 = vrot.lane.b32.xlu2 %v2849_v38, %s2699_s23 }
  0xfa   : > { %614 = vrot.lane.b32.xlu2 %v2864_v50, %s2699_s23 }
 0x102   : > { %610 = vrot.lane.b32.xlu2 %v2856_v42, %s2699_s23  ;;  %s2701_s23 = smov 64  }
 0x110   : > { %768 = vxpose.xlu1.c.b16.start [1/4] (short) (narrow) %v2897_v53, 32 }
 0x11d   : > { %v558_v1 = vpop.permute.xlu1 %557 }
 0x120   : > { %769 = vxpose.xlu1.c.b16.cont [2/4] (short) (narrow) %v2902_v61, 32 }
 0x123   : > { %v562_v6 = vpop.permute.xlu0 %561 }
 0x124   : > { %575 = vmatpush.bf16.msra.mxu1 %v562_v6 }
 0x125   : > { %v556_v7 = vpop.permute.xlu1 %555 }
 0x12b   : > { %v560_v10 = vpop.permute.xlu0 %559 }
 0x12c   : > { %576 = vmatpush.bf16.msra.mxu1 %v560_v10 }
 0x130   : > { %577 = vmatpush.bf16.msra.mxu1 %v558_v1  ;;  %770 = vxpose.xlu1.c.b16.cont [3/4] (short) (narrow) %v2907_v3, 32 }
 0x134   : > { %578 = vmatpush.bf16.msra.mxu1 %v556_v7  ;;  %v795_v11 = vpop.permute.xlu2 %794 }
 0x135   : > { %810 = vmatpush.bf16.msra.mxu3 %v795_v11 }
 0x137   : > { %2445 = vmatmul.msk.bf16.vlgmr.msra.gmra.mxu1 %vm567_vm8, %v2511_v9 }
 0x13c   : > { %v793_v17 = vpop.permute.xlu2 %792 }
 0x13d   : > { %811 = vmatpush.bf16.msra.mxu3 %v793_v17 }
 0x140   : > { %771 = vxpose.xlu1.c.b16.end [4/4] (short) (narrow) %v2916_v15, 32 }
 0x144   : > { %v539_v34 = vpop.permute.xlu2 %538 }
 0x14c   : > { %v617_v18 = vpop.permute.xlu2 %616  ;;  %v791_v20 = vpop.permute.xlu0 %790 }
 0x14d   : > { %629 = vmatpush.bf16.msrb.mxu2 %v617_v18  ;;  %812 = vmatpush.bf16.msra.mxu3 %v791_v20  ;;  %v789_v21 = vpop.permute.xlu1 %788 }
 0x151   : > { %813 = vmatpush.bf16.msra.mxu3 %v789_v21 }
 0x154   : > { %v615_v23 = vpop.permute.xlu2 %614  ;;  %v544_v24 = vpop.permute.xlu0 %543 }
 0x155   : > { %630 = vmatpush.bf16.msrb.mxu2 %v615_v23 }
 0x15c   : > { %v613_v25 = vpop.permute.xlu0 %612  ;;  %v611_v26 = vpop.permute.xlu2 %610 }
 0x15d   : > { %631 = vmatpush.bf16.msrb.mxu2 %v613_v25 }
 0x161   : > { %632 = vmatpush.bf16.msrb.mxu2 %v611_v26 }
 0x193   : > { %2537 = vset.pattern.permute.xlu1 %v2698_v57 }
 0x19a   : > { %597 = vperm.xlu1 %2537, %v593_v44  }
 0x1b4   : > { %v580_v27 = vpop.f32.mrf.mxu1 }
 0x1b5   : > { %v581_v28 = vadd.f32 %v580_v27, %v539_v34 }
 0x1b7   : > { %v589_v30 = vmul.f32 %v2538_v29, %v581_v28 }
 0x1b9   : > { %v740_v32 = vpack.c.bf16 %v589_v30, %v589_v30 }
 0x1bb   : > { %v1009_v37 = vunpack.c.l.b16 %v740_v32 }
 0x1bc   : > { %v582_v31 = vpop.f32.mrf.mxu1  ;;  %v776_v33 = vpop.trf.xlu1 }
 0x1bd   : > { %v583_v35 = vadd.f32 %v582_v31, %v544_v24  ;;  %2451 = vmatmul.msk.bf16.vlgmr.msra.gmra.mxu3 %vm567_vm8, %v776_v33  ;;  %v2512_v24 = vld [vmem:[%s3851_s4] sm:$0xff] }
 0x1be   : > { %2450 = vmatmul.msk.bf16.vlgmr.msrb.gmra.mxu2 %vm567_vm8, %v2512_v24 }
 0x1bf   : > { %v590_v36 = vmul.f32 %v2538_v29, %v583_v35 }
 0x1c1   : > { %v741_v39 = vpack.c.bf16 %v590_v36, %v590_v36 }
 0x1c3   : > { %v1010_v40 = vunpack.c.l.b16 %v741_v39 }
 0x1c5   : > { %v2924_v41 = vpack.c.b16 %v1010_v40, %v1009_v37 }
 0x1c7   : > { %v1026_v57 = vsel %vm1012_vm9, %v2924_v41, 0 }
 0x1c8   : > { %1035 = vmatpush.bf16.xpose.msrb.mxu3 %v1026_v57 }
 0x1cc   : > { %v777_v43 = vpop.trf.xlu1 }
 0x1cd   : > { %2452 = vmatmul.msk.bf16.gmra.mxu3 %vm567_vm8, %v777_v43 }
 0x1dd   : > { %2469 = vmatmul.msk.bf16.vlgmr.msrb.gmra.mxu3 %vm1012_vm9, %v2897_v53 }
 0x1ed   : > { %2470 = vmatmul.msk.bf16.gmra.mxu3 %vm1012_vm9, %v2902_v61 }
 0x1fd   : > { %2471 = vmatmul.msk.bf16.gmra.mxu3 %vm1012_vm9, %v2907_v3 }
 0x20c   : > { %v2980_v16 = vpop.permute.xlu1 %597 }
 0x20d   : > { %2472 = vmatmul.msk.bf16.gmra.mxu3 %vm1012_vm9, %v2916_v15 }
 0x240   : > { %v2940_v45 = vpop.f32.mrf.mxu3 }
 0x248   : > { %v817_v46 = vpop.f32.mrf.mxu3 }
 0x249   : > { %v830_v55 = vmul.f32 %v826_v52, %v817_v46 }
 0x24b   : > { %v838_v60 = vadd.f32 %v834_v58, %v830_v55 }
 0x24d   : > { %v844_v6 = vsel %vm486_vm0, %v838_v60, -inf }
 0x250   : > { %v820_v48 = vpop.f32.mrf.mxu3 }
 0x251   : > { %v831_v51 = vmul.f32 %v827_v47, %v820_v48 }
 0x253   : > { %v2951_v54 = vadd.f32 %v835_v49, %v831_v51 }
 0x255   : > { %v847_v56 = vsel %vm486_vm0, %v2951_v54, -inf }
 0x256   : > { %848 = vmax.xlane.f32.xlu1 %v847_v56 }
 0x258   : > { %v2958_v59 = vpop.f32.mrf.mxu3 }
 0x25e   : > { %845 = vmax.xlane.f32.xlu1 %v844_v6 }
 0x260   : > { %v2961_v8 = vpop.f32.mrf.mxu3 }
 0x261   : > { %v1058_v62 = vsel %vm1057_vm10, %v2961_v8, -inf }
 0x262   : > { %1059 = vmax.xlane.f32.xlu2 %v1058_v62 }
 0x268   : > { %v2965_v63 = vpop.f32.mrf.mxu3 }
 0x269   : > { %v1061_v0 = vsel %vm1057_vm10, %v2965_v63, -inf }
 0x26a   : > { %1062 = vmax.xlane.f32.xlu0 %v1061_v0 }
 0x270   : > { %v1042_v1 = vpop.f32.mrf.mxu3 }
 0x271   : > { %v1064_v10 = vsel %vm1057_vm10, %v1042_v1, -inf }
 0x272   : > { %1065 = vmax.xlane.f32.xlu2 %v1064_v10 }
 0x277   : > { %1230 = vrot.lane.b32.xlu1 %v2916_v15, %s2700_s24 }
 0x278   : > { %v1044_v2 = vpop.f32.mrf.mxu3 }
 0x279   : > { %v1067_v19 = vsel %vm1057_vm10, %v1044_v2, -inf }
 0x27a   : > { %1068 = vmax.xlane.f32.xlu0 %v1067_v19 }
 0x280   : > { %v1047_v4 = vpop.f32.mrf.mxu3 }
 0x281   : > { %v1070_v5 = vsel %vm1057_vm10, %v1047_v4, -inf }
 0x282   : > { %1071 = vmax.xlane.f32.xlu2 %v1070_v5 }
 0x288   : > { %v1049_v7 = vpop.f32.mrf.mxu3 }
 0x289   : > { %v1073_v9 = vsel %vm1057_vm10, %v1049_v7, -inf }
 0x28a   : > { %1074 = vmax.xlane.f32.xlu0 %v1073_v9 }
 0x290   : > { %v1052_v11 = vpop.f32.mrf.mxu3 }
 0x291   : > { %v1076_v12 = vsel %vm1057_vm10, %v1052_v11, -inf }
 0x292   : > { %1077 = vmax.xlane.f32.xlu0 %v1076_v12 }
 0x298   : > { %v2976_v13 = vpop.f32.mrf.mxu3 }
 0x299   : > { %v1079_v14 = vsel %vm1057_vm10, %v2976_v13, -inf }
 0x29a   : > { %1080 = vmax.xlane.f32.xlu2 %v1079_v14  ;;  %v634_v14 = vpop.f32.mrf.mxu2 }
 0x2c9   : > { %v2982_v17 = vpop.xlane.xlu1 %848 }
 0x2d1   : > { %v846_v34 = vpop.xlane.xlu1 %845 }
 0x2d2   : > { %v854_v18 = vsub.f32 %v838_v60, %v846_v34 }
 0x2d4   : > { %v859_v20 = vmul.f32 1.442695, %v854_v18  ;;  %v635_v18 = vadd.f32 %v634_v14, %v2980_v16  ;;  %v833_v16 = vld [vmem:[%s3858_s11] sm:$0xff] }
 0x2d5   : > { %v1060_v25 = vpop.xlane.xlu2 %1059 }
 0x2d6   : > { %2545 = vpow2.f32 %v859_v20  ;;  %v1082_v55 = vsub.f32 %v2961_v8, %v1060_v25  ;;  %v636_v20 = vpop.f32.mrf.mxu2  ;;  %v825_v25 = vld [vmem:[%s3857_s10] sm:$0xff] }
 0x2d8   : > { %v1090_v60 = vmul.f32 1.442695, %v1082_v55 }
 0x2dc   : > { %v2984_v21 = vpop.eup %2545 }
 0x2dd   : > { %v868_v23 = vsel %vm486_vm0, %v2984_v21, 0.0  ;;  %v1063_v26 = vpop.xlane.xlu0 %1062 }
 0x2de   : > { %869 = vadd.xlane.f32.xlu1 %v868_v23  ;;  %v1083_v10 = vsub.f32 %v2965_v63, %v1063_v26 }
 0x2e5   : > { %v1066_v27 = vpop.xlane.xlu2 %1065 }
 0x2e6   : > { %v1084_v36 = vsub.f32 %v1042_v1, %v1066_v27  ;;  %v594_v1 = vld [vmem:[%s3852_s5 + $0x8] sm:$0xff]  ;;  %v855_v27 = vsub.f32 %v2951_v54, %v2982_v17 }
 0x2e8   : > { %v1094_v40 = vmul.f32 1.442695, %v1084_v36 }
 0x2ed   : > { %v1069_v28 = vpop.xlane.xlu0 %1068 }
 0x2ee   : > { %v1085_v46 = vsub.f32 %v1044_v2, %v1069_v28  ;;  %v1092_v2 = vmul.f32 1.442695, %v1083_v10 }
 0x2f0   : > { %v1096_v49 = vmul.f32 1.442695, %v1085_v46 }
 0x2f5   : > { %v1072_v29 = vpop.xlane.xlu2 %1071 }
 0x2f6   : > { %v1086_v30 = vsub.f32 %v1047_v4, %v1072_v29 }
 0x2f8   : > { %v1098_v31 = vmul.f32 1.442695, %v1086_v30  ;;  %v829_v30 = vmul.f32 %v825_v25, %v2940_v45 }
 0x2fa   : > { %2547 = vpow2.f32 %v1098_v31 }
 0x2fd   : > { %v1075_v32 = vpop.xlane.xlu0 %1074 }
 0x2fe   : > { %v1087_v33 = vsub.f32 %v1049_v7, %v1075_v32  ;;  %v861_v32 = vmul.f32 1.442695, %v855_v27 }
 0x300   : > { %v2992_v35 = vpop.eup %2547  ;;  %v1100_v37 = vmul.f32 1.442695, %v1087_v33  ;;  %v3048_v33 = vadd.f32 %v833_v16, %v829_v30 }
 0x301   : > { %v1118_v39 = vsel %vm1057_vm10, %v2992_v35, 0.0 }
 0x302   : > { %2549 = vpow2.f32 %v1100_v37  ;;  %1119 = vadd.xlane.f32.xlu2 %v1118_v39  ;;  %v841_v36 = vsel %vm486_vm0, %v3048_v33, -inf }
 0x303   : > { %2551 = vpow2.f32 %v1094_v40 }
 0x305   : > { %v1078_v57 = vpop.xlane.xlu0 %1077 }
 0x306   : > { %v1088_v43 = vsub.f32 %v1052_v11, %v1078_v57 }
 0x308   : > { %v2996_v44 = vpop.eup %2549  ;;  %v1102_v47 = vmul.f32 1.442695, %v1088_v43 }
 0x309   : > { %v1121_v48 = vsel %vm1057_vm10, %v2996_v44, 0.0  ;;  %v3000_v51 = vpop.eup %2551 }
 0x30a   : > { %2553 = vpow2.f32 %v1102_v47  ;;  %1122 = vadd.xlane.f32.xlu0 %v1121_v48  ;;  %v1112_v56 = vsel %vm1057_vm10, %v3000_v51, 0.0 }
 0x30b   : > { %2555 = vpow2.f32 %v1096_v49 }
 0x30c   : > { %2557 = vpow2.f32 %v1090_v60 }
 0x30d   : > { %2559 = vpow2.f32 %v1092_v2  ;;  %v1081_v5 = vpop.xlane.xlu2 %1080 }
 0x30e   : > { %v1089_v7 = vsub.f32 %v2976_v13, %v1081_v5  ;;  %v742_v13 = vpack.c.bf16 %v635_v18, %v635_v18 }
 0x310   : > { %v3002_v52 = vpop.eup %2553  ;;  %v1104_v9 = vmul.f32 1.442695, %v1089_v7  ;;  %v1152_v28 = vunpack.c.l.b16 %v742_v13 }
 0x311   : > { %v1124_v58 = vsel %vm1057_vm10, %v3002_v52, 0.0  ;;  %v3009_v6 = vpop.eup %2555 }
 0x312   : > { %1113 = vadd.xlane.f32.xlu0 %v1112_v56  ;;  %1125 = vadd.xlane.f32.xlu2 %v1124_v58  ;;  %v1115_v62 = vsel %vm1057_vm10, %v3009_v6, 0.0  ;;  %v3013_v0 = vpop.eup %2557  ;;  %2561 = vpow2.f32 %v1104_v9 }
 0x313   : > { %v1106_v8 = vsel %vm1057_vm10, %v3013_v0, 0.0  ;;  %v3025_v19 = vpop.eup %2559  ;;  %2563 = vpow2.f32 %v861_v32 }
 0x314   : > { %v1109_v4 = vsel %vm1057_vm10, %v3025_v19, 0.0 }
 0x318   : > { %v2562_v11 = vpop.eup %2561 }
 0x319   : > { %v1127_v12 = vsel %vm1057_vm10, %v2562_v11, 0.0  ;;  %v3052_v54 = vpop.eup %2563 }
 0x31a   : > { %1116 = vadd.xlane.f32.xlu0 %v1115_v62  ;;  %v871_v45 = vsel %vm486_vm0, %v3052_v54, 0.0 }
 0x322   : > { %1107 = vadd.xlane.f32.xlu0 %v1106_v8 }
 0x32a   : > { %602 = vperm.xlu2 %2535, %v594_v1  }
 0x336   : > { %1232 = vrot.lane.b32.xlu0 %v2924_v41, %s2700_s24 }
 0x33e   : > { %1224 = vrot.lane.b32.xlu0 %v2897_v53, %s2700_s24 }
 0x353   : > { %1110 = vadd.xlane.f32.xlu2 %v1109_v4 }
 0x368   : > { %1128 = vadd.xlane.f32.xlu0 %v1127_v12 }
 0x36b   : > { %1226 = vrot.lane.b32.xlu2 %v2902_v61, %s2700_s24 }
 0x373   : > { %1228 = vrot.lane.b32.xlu2 %v2907_v3, %s2700_s24 }
 0x375   : > { %v1120_v63 = vpop.xlane.xlu2 %1119 }
 0x37d   : > { %v1123_v17 = vpop.xlane.xlu0 %1122 }
 0x385   : > { %v1126_v34 = vpop.xlane.xlu2 %1125  ;;  %v1114_v37 = vpop.xlane.xlu0 %1113 }
 0x386   : > { %2565 = vrcp.f32 %v1126_v34  ;;  %v828_v34 = vld [vmem:[%s3857_s10 + $0x18] sm:$0xff] }
 0x38c   : > { %v2566_v47 = vpop.eup %2565 }
 0x38d   : > { %v603_v23 = vpop.permute.xlu2 %602  ;;  %v1117_v39 = vpop.xlane.xlu0 %1116  ;;  %v1144_v49 = vmul.f32 %v2566_v47, %v3002_v52 }
 0x38e   : > { %v637_v24 = vadd.f32 %v636_v20, %v603_v23 }
 0x390   : > { %v743_v26 = vpack.c.bf16 %v637_v24, %v637_v24 }
 0x392   : > { %v1153_v29 = vunpack.c.l.b16 %v743_v26 }
 0x394   : > { %v3042_v31 = vpack.c.b16 %v1153_v29, %v1152_v28 }
 0x395   : > { %v1108_v40 = vpop.xlane.xlu0 %1107 }
 0x396   : > { %1156 = vxpose.xlu0.c.b16.start.end [1/1] (short) (narrow) %v3042_v31, 16 }
 0x39c   : > { %842 = vmax.xlane.f32.xlu2 %v841_v36 }
 0x3a4   : > { %872 = vadd.xlane.f32.xlu2 %v871_v45 }
 0x3a8   : > { %v1233_v57 = vpop.permute.xlu0 %1232 }
 0x3a9   : > { %v1247_v23 = vsel %vm1012_vm9, %v1233_v57, 0 }
 0x3b0   : > { %v1225_v43 = vpop.permute.xlu0 %1224 }
 0x3c6   : > { %v1111_v10 = vpop.xlane.xlu2 %1110 }
 0x3db   : > { %v1129_v46 = vpop.xlane.xlu0 %1128 }
 0x3dc   : > { %2567 = vrcp.f32 %v1129_v46 }
 0x3dd   : > { %2569 = vrcp.f32 %v1123_v17 }
 0x3de   : > { %2571 = vrcp.f32 %v1120_v63 }
 0x3df   : > { %2573 = vrcp.f32 %v1117_v39 }
 0x3e0   : > { %2575 = vrcp.f32 %v1114_v37 }
 0x3e1   : > { %2577 = vrcp.f32 %v1111_v10 }
 0x3e2   : > { %v2568_v48 = vpop.eup %2567  ;;  %2579 = vrcp.f32 %v1108_v40 }
 0x3e3   : > { %v1145_v55 = vmul.f32 %v2568_v48, %v2562_v11  ;;  %v2570_v56 = vpop.eup %2569 }
 0x3e4   : > { %v2572_v60 = vpop.eup %2571  ;;  %v1143_v8 = vmul.f32 %v2570_v56, %v2996_v44 }
 0x3e5   : > { %v1149_v58 = vpack.c.bf16 %v1145_v55, %v1144_v49  ;;  %v1142_v1 = vmul.f32 %v2572_v60, %v2992_v35  ;;  %v2574_v4 = vpop.eup %2573 }
 0x3e6   : > { %v2576_v5 = vpop.eup %2575  ;;  %v1141_v7 = vmul.f32 %v2574_v4, %v3009_v6  ;;  %v832_v6 = vmul.f32 %v828_v34, %v2958_v59  ;;  %v1227_v59 = vpop.permute.xlu2 %1226 }
 0x3e7   : > { %v1185_v62 = vsel %vm1057_vm10, %v1149_v58, 0  ;;  %v1148_v2 = vpack.c.bf16 %v1143_v8, %v1142_v1  ;;  %v1140_v9 = vmul.f32 %v2576_v5, %v3000_v51  ;;  %v2578_v12 = vpop.eup %2577  ;;  %v836_v51 = vld [vmem:[%s3858_s11 + $0x18] sm:$0xff] }
 0x3e8   : > { %1191 = vmatpush.bf16.xpose.msrb.mxu0 %v1185_v62  ;;  %v2580_v44 = vpop.eup %2579  ;;  %v1139_v35 = vmul.f32 %v2578_v12, %v3025_v19  ;;  %v840_v19 = vadd.f32 %v836_v51, %v832_v6 }
 0x3e9   : > { %v1182_v52 = vsel %vm1057_vm10, %v1148_v2, 0  ;;  %v1147_v11 = vpack.c.bf16 %v1141_v7, %v1140_v9  ;;  %v1138_v14 = vmul.f32 %v2580_v44, %v3013_v0 }
 0x3ea   : > { %v850_v0 = vsel %vm486_vm0, %v840_v19, -inf }
 0x3eb   : > { %v1179_v63 = vsel %vm1057_vm10, %v1147_v11, 0  ;;  %v1146_v18 = vpack.c.bf16 %v1139_v35, %v1138_v14 }
 0x3ed   : > { %v1176_v20 = vsel %vm1057_vm10, %v1146_v18, 0 }
 0x3ee   : > { %v1229_v24 = vpop.permute.xlu2 %1228 }
 0x3f0   : > { %1192 = vmatpush.bf16.xpose.msrb.mxu0 %v1182_v52 }
 0x3f8   : > { %1193 = vmatpush.bf16.xpose.msrb.mxu0 %v1179_v63 }
 0x400   : > { %1194 = vmatpush.bf16.xpose.msrb.mxu0 %v1176_v20 }
 0x407   : > { %851 = vmax.xlane.f32.xlu0 %v850_v0 }
 0x408   : > { %1256 = vmatpush.bf16.xpose.msra.mxu0 %v1247_v23 }
 0x40f   : > { %v843_v25 = vpop.xlane.xlu2 %842 }
 0x410   : > { %v853_v28 = vsub.f32 %v3048_v33, %v843_v25 }
 0x412   : > { %v857_v30 = vmul.f32 1.442695, %v853_v28 }
 0x417   : > { %v873_v58 = vpop.xlane.xlu2 %872 }
 0x41b   : > { %893 = vrot.lane.b32.xlu0 %v2849_v38, %s2701_s23  ;;  %v1231_v38 = vpop.permute.xlu1 %1230 }
 0x423   : > { %v870_v1 = vpop.xlane.xlu1 %869 }
 0x442   : > { %v1164_v13 = vpop.trf.xlu0 }
 0x443   : > { %2473 = vmatmul.msk.bf16.vlgmr.msrb.gmra.mxu0 %vm1057_vm10, %v1164_v13 }
 0x453   : > { %2474 = vmatmul.msk.bf16.vlgmr.msra.gmra.mxu0 %vm1012_vm9, %v1225_v43 }
 0x463   : > { %2475 = vmatmul.msk.bf16.gmra.mxu0 %vm1012_vm9, %v1227_v59 }
 0x473   : > { %2476 = vmatmul.msk.bf16.gmra.mxu0 %vm1012_vm9, %v1229_v24 }
 0x47a   : > { %v852_v26 = vpop.xlane.xlu0 %851 }
 0x47b   : > { %v856_v27 = vsub.f32 %v840_v19, %v852_v26 }
 0x47d   : > { %v863_v29 = vmul.f32 1.442695, %v856_v27  ;;  %v2514_v27 = vld [vmem:[%s3855_s8 + $0x8] sm:$0xff] }
 0x47e   : > { %984 = vmatpush.bf16.msra.mxu2 %v2514_v27 }
 0x47f   : > { %2581 = vpow2.f32 %v863_v29 }
 0x480   : > { %2583 = vpow2.f32 %v857_v30 }
 0x481   : > { %2585 = vrcp.f32 %v873_v58 }
 0x483   : > { %2477 = vmatmul.msk.bf16.gmra.mxu0 %vm1012_vm9, %v1231_v38  ;;  %v2513_v38 = vld [vmem:[%s3855_s8] sm:$0xff] }
 0x484   : > { %985 = vmatpush.bf16.msra.mxu2 %v2513_v38 }
 0x485   : > { %v2582_v16 = vpop.eup %2581 }
 0x486   : > { %v874_v32 = vsel %vm486_vm0, %v2582_v16, 0.0  ;;  %v2584_v36 = vpop.eup %2583 }
 0x487   : > { %875 = vadd.xlane.f32.xlu2 %v874_v32  ;;  %v865_v17 = vsel %vm486_vm0, %v2584_v36, 0.0  ;;  %v2586_v10 = vpop.eup %2585 }
 0x488   : > { %v883_v9 = vmul.f32 %v2586_v10, %v3052_v54 }
 0x48d   : > { %v894_v13 = vpop.permute.xlu0 %893 }
 0x48f   : > { %866 = vadd.xlane.f32.xlu2 %v865_v17 }
 0x4a7   : > { %887 = vrot.lane.b32.xlu2 %v2856_v42, %s2701_s23 }
 0x4af   : > { %889 = vrot.lane.b32.xlu2 %v2828_v22, %s2701_s23 }
 0x4b7   : > { %891 = vrot.lane.b32.xlu2 %v2864_v50, %s2701_s23 }
 0x4c0   : > { %v1196_v33 = vpop.f32.mrf.mxu0 }
 0x4c1   : > { %v1201_v45 = vrot.slane %v1196_v33, 1  ;;  %v1202_v37 = vrot.slane %v1196_v33, 2  ;;  %v1203_v39 = vrot.slane %v1196_v33, 3  ;;  %1216 = vst.msk [vmem:[#allocation2] sm:$0x1] %vm1215_vm11, %v1196_v33  ;;  %v1204_v40 = vrot.slane %v1196_v33, 4 }
 0x4c2   : > { %v1205_v57 = vrot.slane %v1196_v33, 5  ;;  %v1206_v43 = vrot.slane %v1196_v33, 6  ;;  %v1207_v46 = vrot.slane %v1196_v33, 7 }
 0x4c3   : > { %1217 = vst.msk [vmem:[#allocation2 + $0x4] sm:$0x1] %vm1215_vm11, %v1201_v45 }
 0x4c4   : > { %1218 = vst.msk [vmem:[#allocation2 + $0x8] sm:$0x1] %vm1215_vm11, %v1202_v37 }
 0x4c5   : > { %1219 = vst.msk [vmem:[#allocation2 + $0xc] sm:$0x1] %vm1215_vm11, %v1203_v39 }
 0x4c6   : > { %1220 = vst.msk [vmem:[#allocation2 + $0x10] sm:$0x1] %vm1215_vm11, %v1204_v40 }
 0x4c7   : > { %1221 = vst.msk [vmem:[#allocation2 + $0x14] sm:$0x1] %vm1215_vm11, %v1205_v57 }
 0x4c8   : > { %1222 = vst.msk [vmem:[#allocation2 + $0x18] sm:$0x1] %vm1215_vm11, %v1206_v43  ;;  %v1198_v22 = vpop.f32.mrf.mxu0 }
 0x4c9   : > { %1223 = vst.msk [vmem:[#allocation2 + $0x1c] sm:$0x1] %vm1215_vm11, %v1207_v46 }
 0x4d0   : > { %v3096_v42 = vpop.f32.mrf.mxu0 }
 0x4d1   : > { %v1278_v14 = vsel %vm1057_vm10, %v3096_v42, -inf }
 0x4d8   : > { %v3098_v50 = vpop.f32.mrf.mxu0 }
 0x4d9   : > { %v1281_v54 = vsel %vm1057_vm10, %v3098_v50, -inf }
 0x4e0   : > { %v3100_v47 = vpop.f32.mrf.mxu0 }
 0x4e1   : > { %v1284_v48 = vsel %vm1057_vm10, %v3100_v47, -inf }
 0x4e2   : > { %1285 = vmax.xlane.f32.xlu0 %v1284_v48 }
 0x4e8   : > { %v3104_v49 = vpop.f32.mrf.mxu0 }
 0x4e9   : > { %v1287_v5 = vsel %vm1057_vm10, %v3104_v49, -inf }
 0x4f0   : > { %v3106_v55 = vpop.f32.mrf.mxu0 }
 0x4f1   : > { %v1290_v56 = vsel %vm1057_vm10, %v3106_v55, -inf }
 0x4f2   : > { %1291 = vmax.xlane.f32.xlu1 %v1290_v56 }
 0x4f8   : > { %v1270_v60 = vpop.f32.mrf.mxu0 }
 0x4f9   : > { %v1293_v62 = vsel %vm1057_vm10, %v1270_v60, -inf }
 0x4fa   : > { %v876_v8 = vpop.xlane.xlu2 %875  ;;  %1294 = vmax.xlane.f32.xlu1 %v1293_v62 }
 0x4fb   : > { %2587 = vrcp.f32 %v876_v8 }
 0x4fc   : > { %2589 = vrcp.f32 %v870_v1 }
 0x500   : > { %v3111_v2 = vpop.f32.mrf.mxu0 }
 0x501   : > { %v2588_v4 = vpop.eup %2587  ;;  %v1296_v52 = vsel %vm1057_vm10, %v3111_v2, -inf }
 0x502   : > { %v867_v7 = vpop.xlane.xlu2 %866  ;;  %1288 = vmax.xlane.f32.xlu1 %v1287_v5  ;;  %1297 = vmax.xlane.f32.xlu2 %v1296_v52  ;;  %v884_v11 = vmul.f32 %v2588_v4, %v2582_v16  ;;  %v2590_v63 = vpop.eup %2589 }
 0x503   : > { %2591 = vrcp.f32 %v867_v7  ;;  %v882_v18 = vmul.f32 %v2590_v63, %v2984_v21 }
 0x504   : > { %v886_v12 = vpack.c.bf16 %v884_v11, %v883_v9 }
 0x506   : > { %v911_v44 = vsel %vm486_vm0, %v886_v12, 0 }
 0x507   : > { %919 = vmatpush.bf16.xpose.msrb.mxu1 %v911_v44 }
 0x508   : > { %v1275_v23 = vpop.f32.mrf.mxu0 }
 0x509   : > { %v2592_v35 = vpop.eup %2591  ;;  %v1299_v19 = vsel %vm1057_vm10, %v1275_v23, -inf }
 0x50a   : > { %1279 = vmax.xlane.f32.xlu1 %v1278_v14  ;;  %v881_v34 = vmul.f32 %v2592_v35, %v2584_v36  ;;  %v888_v51 = vpop.permute.xlu2 %887 }
 0x50c   : > { %v885_v6 = vpack.c.bf16 %v882_v18, %v881_v34 }
 0x50e   : > { %v908_v20 = vsel %vm486_vm0, %v885_v6, 0 }
 0x50f   : > { %920 = vmatpush.bf16.xpose.msrb.mxu1 %v908_v20 }
 0x512   : > { %1282 = vmax.xlane.f32.xlu1 %v1281_v54  ;;  %v890_v0 = vpop.permute.xlu2 %889 }
 0x516   : > { %2453 = vmatmul.msk.bf16.vlgmr.msrb.gmra.mxu1 %vm486_vm0, %v888_v51 }
 0x51a   : > { %1300 = vmax.xlane.f32.xlu1 %v1299_v19  ;;  %v892_v21 = vpop.permute.xlu2 %891 }
 0x526   : > { %2454 = vmatmul.msk.bf16.gmra.mxu1 %vm486_vm0, %v890_v0 }
 0x533   : > { %1370 = vrot.lane.b32.xlu1 %v3042_v31, %s2700_s24 }
 0x536   : > { %2455 = vmatmul.msk.bf16.gmra.mxu1 %vm486_vm0, %v892_v21 }
 0x546   : > { %2456 = vmatmul.msk.bf16.gmra.mxu1 %vm486_vm0, %v894_v13 }
 0x555   : > { %v1286_v16 = vpop.xlane.xlu0 %1285 }
 0x556   : > { %v1304_v17 = vsub.f32 %v3100_v47, %v1286_v16 }
 0x558   : > { %v1314_v45 = vmul.f32 1.442695, %v1304_v17 }
 0x565   : > { %v1292_v59 = vpop.xlane.xlu1 %1291 }
 0x566   : > { %v1306_v40 = vsub.f32 %v3106_v55, %v1292_v59 }
 0x56d   : > { %v1295_v24 = vpop.xlane.xlu1 %1294 }
 0x56e   : > { %v1307_v25 = vsub.f32 %v1270_v60, %v1295_v24 }
 0x570   : > { %v1320_v26 = vmul.f32 1.442695, %v1307_v25 }
 0x572   : > { %2593 = vpow2.f32 %v1320_v26 }
 0x575   : > { %v1289_v28 = vpop.xlane.xlu1 %1288  ;;  %v1298_v48 = vpop.xlane.xlu2 %1297 }
 0x576   : > { %v1305_v43 = vsub.f32 %v3104_v49, %v1289_v28  ;;  %v1308_v60 = vsub.f32 %v3111_v2, %v1298_v48 }
 0x578   : > { %v3135_v29 = vpop.eup %2593  ;;  %v1316_v47 = vmul.f32 1.442695, %v1305_v43  ;;  %v1322_v10 = vmul.f32 1.442695, %v1308_v60 }
 0x579   : > { %v1341_v30 = vsel %vm1057_vm10, %v3135_v29, 0.0 }
 0x57a   : > { %1342 = vadd.xlane.f32.xlu1 %v1341_v30 }
 0x57d   : > { %v1280_v32 = vpop.xlane.xlu1 %1279 }
 0x57e   : > { %v1302_v36 = vsub.f32 %v3096_v42, %v1280_v32  ;;  %v1318_v42 = vmul.f32 1.442695, %v1306_v40 }
 0x580   : > { %v1310_v33 = vmul.f32 1.442695, %v1302_v36 }
 0x582   : > { %2595 = vpow2.f32 %v1310_v33 }
 0x583   : > { %2597 = vpow2.f32 %v1314_v45 }
 0x585   : > { %v1283_v37 = vpop.xlane.xlu1 %1282 }
 0x586   : > { %v1303_v39 = vsub.f32 %v3098_v50, %v1283_v37 }
 0x588   : > { %v3146_v57 = vpop.eup %2595  ;;  %v1312_v46 = vmul.f32 1.442695, %v1303_v39 }
 0x589   : > { %v1326_v22 = vsel %vm1057_vm10, %v3146_v57, 0.0  ;;  %v3151_v58 = vpop.eup %2597 }
 0x58a   : > { %2599 = vpow2.f32 %v1312_v46  ;;  %1327 = vadd.xlane.f32.xlu2 %v1326_v22  ;;  %v1332_v62 = vsel %vm1057_vm10, %v3151_v58, 0.0 }
 0x58b   : > { %2601 = vpow2.f32 %v1318_v42 }
 0x58c   : > { %2603 = vpow2.f32 %v1316_v47 }
 0x58d   : > { %v1301_v56 = vpop.xlane.xlu1 %1300 }
 0x58e   : > { %v1309_v50 = vsub.f32 %v1275_v23, %v1301_v56  ;;  %v3209_v56 = vld [vmem:[%s3856_s9] ss:$0 sm:$0xff] }
 0x590   : > { %v3153_v55 = vpop.eup %2599  ;;  %v1324_v49 = vmul.f32 1.442695, %v1309_v50 }
 0x591   : > { %v1329_v8 = vsel %vm1057_vm10, %v3153_v55, 0.0  ;;  %v3160_v4 = vpop.eup %2601 }
 0x592   : > { %2605 = vpow2.f32 %v1324_v49  ;;  %1333 = vadd.xlane.f32.xlu2 %v1332_v62  ;;  %1330 = vadd.xlane.f32.xlu0 %v1329_v8  ;;  %v3162_v5 = vpop.eup %2603  ;;  %v1338_v2 = vsel %vm1057_vm10, %v3160_v4, 0.0 }
 0x593   : > { %v922_v1 = vpop.f32.mrf.mxu1  ;;  %2607 = vpow2.f32 %v1322_v10  ;;  %v1335_v7 = vsel %vm1057_vm10, %v3162_v5, 0.0 }
 0x598   : > { %v2606_v52 = vpop.eup %2605 }
 0x599   : > { %v1347_v9 = vsel %vm1057_vm10, %v2606_v52, 0.0  ;;  %v2608_v44 = vpop.eup %2607 }
 0x59a   : > { %1339 = vadd.xlane.f32.xlu2 %v1338_v2  ;;  %1336 = vadd.xlane.f32.xlu0 %v1335_v7  ;;  %v1344_v63 = vsel %vm1057_vm10, %v2608_v44, 0.0 }
 0x59b   : > { %1348 = vadd.xlane.f32.xlu1 %v1347_v9  ;;  %v924_v11 = vpop.f32.mrf.mxu1 }
 0x59c   : > { %v942_v12 = vpack.c.bf16 %v924_v11, %v922_v1 }
 0x59e   : > { %2465 = vmatmul.msk.bf16.vlgmr.msra.gmra.mxu2 %vm486_vm0, %v942_v12 }
 0x5a2   : > { %1345 = vadd.xlane.f32.xlu2 %v1344_v63 }
 0x5a3   : > { %v927_v35 = vpop.f32.mrf.mxu1 }
 0x5ab   : > { %v929_v14 = vpop.f32.mrf.mxu1 }
 0x5ac   : > { %v943_v34 = vpack.c.bf16 %v929_v14, %v927_v35 }
 0x5ae   : > { %2466 = vmatmul.msk.bf16.gmra.mxu2 %vm486_vm0, %v943_v34  ;;  %1440 = vrot.lane.b32.xlu0 %v2897_v53, %s2702_s30 }
 0x5b3   : > { %v932_v18 = vpop.f32.mrf.mxu1 }
 0x5b4   : > { %1664 = vrot.lane.b32.xlu1 %v2924_v41, %s2703_s14 }
 0x5b6   : > { %1442 = vrot.lane.b32.xlu0 %v2902_v61, %s2702_s30 }
 0x5ba   : > { %1448 = vrot.lane.b32.xlu2 %v2924_v41, %s2702_s30  ;;  %v1371_v41 = vpop.permute.xlu1 %1370 }
 0x5bb   : > { %v934_v6 = vpop.f32.mrf.mxu1 }
 0x5bc   : > { %v944_v20 = vpack.c.bf16 %v934_v6, %v932_v18 }
 0x5be   : > { %2467 = vmatmul.msk.bf16.gmra.mxu2 %vm486_vm0, %v944_v20  ;;  %1444 = vrot.lane.b32.xlu0 %v2907_v3, %s2702_s30 }
 0x5c2   : > { %1656 = vrot.lane.b32.xlu2 %v2897_v53, %s2703_s14 }
 0x5c3   : > { %v937_v54 = vpop.f32.mrf.mxu1 }
 0x5c6   : > { %1446 = vrot.lane.b32.xlu0 %v2916_v15, %s2702_s30 }
 0x5ca   : > { %1658 = vrot.lane.b32.xlu2 %v2902_v61, %s2703_s14 }
 0x5cb   : > { %v939_v51 = vpop.f32.mrf.mxu1 }
 0x5cc   : > { %v945_v23 = vpack.c.bf16 %v939_v51, %v937_v54 }
 0x5ce   : > { %2468 = vmatmul.msk.bf16.gmra.mxu2 %vm486_vm0, %v945_v23  ;;  %1662 = vrot.lane.b32.xlu0 %v2916_v15, %s2703_s14 }
 0x5d2   : > { %1660 = vrot.lane.b32.xlu2 %v2907_v3, %s2703_s14 }
 0x5e9   : > { %1373 = vxpose.xlu1.c.b16.start.end [1/1] (short) (narrow) %v1371_v41, 16 }
 0x5ed   : > { %v1343_v0 = vpop.xlane.xlu1 %1342 }
 0x5fd   : > { %v1328_v53 = vpop.xlane.xlu2 %1327 }
 0x605   : > { %v1334_v19 = vpop.xlane.xlu2 %1333  ;;  %v1331_v59 = vpop.xlane.xlu0 %1330 }
 0x60d   : > { %v1340_v21 = vpop.xlane.xlu2 %1339  ;;  %v1337_v26 = vpop.xlane.xlu0 %1336 }
 0x60e   : > { %v1349_v13 = vpop.xlane.xlu1 %1348 }
 0x60f   : > { %2609 = vrcp.f32 %v1349_v13 }
 0x615   : > { %v1346_v61 = vpop.xlane.xlu2 %1345  ;;  %v2610_v24 = vpop.eup %2609 }
 0x616   : > { %2611 = vrcp.f32 %v1346_v61  ;;  %v1365_v28 = vmul.f32 %v2610_v24, %v2606_v52 }
 0x617   : > { %2613 = vrcp.f32 %v1340_v21 }
 0x618   : > { %2615 = vrcp.f32 %v1343_v0 }
 0x619   : > { %2617 = vrcp.f32 %v1337_v26 }
 0x61a   : > { %2619 = vrcp.f32 %v1334_v19 }
 0x61b   : > { %2621 = vrcp.f32 %v1331_v59 }
 0x61c   : > { %v2612_v25 = vpop.eup %2611  ;;  %2623 = vrcp.f32 %v1328_v53 }
 0x61d   : > { %v1449_v15 = vpop.permute.xlu2 %1448  ;;  %v1364_v27 = vmul.f32 %v2612_v25, %v2608_v44  ;;  %v2614_v3 = vpop.eup %2613 }
 0x61e   : > { %v1463_v30 = vsel %vm1012_vm9, %v1449_v15, 0  ;;  %v2616_v16 = vpop.eup %2615  ;;  %v1362_v17 = vmul.f32 %v2614_v3, %v3160_v4 }
 0x61f   : > { %1472 = vmatpush.bf16.xpose.msrb.mxu2 %v1463_v30  ;;  %v1369_v38 = vpack.c.bf16 %v1365_v28, %v1364_v27  ;;  %v1363_v33 = vmul.f32 %v2616_v16, %v3135_v29  ;;  %v2618_v39 = vpop.eup %2617 }
 0x620   : > { %v1441_v45 = vpop.permute.xlu0 %1440  ;;  %v2620_v40 = vpop.eup %2619  ;;  %v1361_v22 = vmul.f32 %v2618_v39, %v3162_v5 }
 0x621   : > { %v3195_v32 = vpop.f32.mrf.mxu2  ;;  %v1402_v36 = vsel %vm1057_vm10, %v1369_v38, 0  ;;  %v1368_v37 = vpack.c.bf16 %v1363_v33, %v1362_v17  ;;  %v1360_v42 = vmul.f32 %v2620_v40, %v3151_v58  ;;  %v2622_v48 = vpop.eup %2621 }
 0x622   : > { %1408 = vmatpush.bf16.xpose.msra.mxu1 %v1402_v36  ;;  %v2624_v29 = vpop.eup %2623  ;;  %v1359_v49 = vmul.f32 %v2622_v48, %v3153_v55 }
 0x623   : > { %v1399_v46 = vsel %vm1057_vm10, %v1368_v37, 0  ;;  %v1367_v47 = vpack.c.bf16 %v1361_v22, %v1360_v42  ;;  %v1358_v8 = vmul.f32 %v2624_v29, %v3146_v57 }
 0x625   : > { %v1396_v60 = vsel %vm1057_vm10, %v1367_v47, 0  ;;  %v1366_v1 = vpack.c.bf16 %v1359_v49, %v1358_v8  ;;  %v1657_v63 = vpop.permute.xlu2 %1656 }
 0x626   : > { %2479 = vmatmul.msk.bf16.vlgmr.msrb.gmra.mxu2 %vm1012_vm9, %v1441_v45  ;;  %v1665_v10 = vpop.permute.xlu1 %1664 }
 0x627   : > { %v1393_v5 = vsel %vm1057_vm10, %v1366_v1, 0  ;;  %v1679_v52 = vsel %vm1012_vm9, %v1665_v10, 0 }
 0x628   : > { %v1443_v58 = vpop.permute.xlu0 %1442 }
 0x629   : > { %v3201_v43 = vpop.f32.mrf.mxu2 }
 0x62a   : > { %1409 = vmatpush.bf16.xpose.msra.mxu1 %v1399_v46 }
 0x62d   : > { %v1659_v34 = vpop.permute.xlu2 %1658 }
 0x630   : > { %v1445_v2 = vpop.permute.xlu0 %1444 }
 0x631   : > { %v992_v50 = vpop.f32.mrf.mxu2 }
 0x632   : > { %v3214_v62 = vadd.f32 %v3209_v56, %v992_v50  ;;  %1410 = vmatpush.bf16.xpose.msra.mxu1 %v1396_v60 }
 0x635   : > { %v1661_v20 = vpop.permute.xlu2 %1660 }
 0x636   : > { %2480 = vmatmul.msk.bf16.gmra.mxu2 %vm1012_vm9, %v1443_v58 }
 0x638   : > { %v1447_v9 = vpop.permute.xlu0 %1446 }
 0x639   : > { %v3218_v4 = vpop.f32.mrf.mxu2 }
 0x63a   : > { %1411 = vmatpush.bf16.xpose.msra.mxu1 %v1393_v5 }
 0x640   : > { %v1663_v41 = vpop.permute.xlu0 %1662 }
 0x641   : > { %v3222_v55 = vpop.f32.mrf.mxu2 }
 0x642   : > { %1688 = vmatpush.bf16.xpose.msrb.mxu1 %v1679_v52 }
 0x646   : > { %2481 = vmatmul.msk.bf16.gmra.mxu2 %vm1012_vm9, %v1445_v2 }
 0x649   : > { %v999_v7 = vpop.f32.mrf.mxu2 }
 0x64a   : > { %v3226_v57 = vadd.f32 %v3209_v56, %v999_v7 }
 0x651   : > { %v3230_v12 = vpop.f32.mrf.mxu2 }
 0x656   : > { %2482 = vmatmul.msk.bf16.gmra.mxu2 %vm1012_vm9, %v1447_v9 }
 0x659   : > { %v3232_v44 = vpop.f32.mrf.mxu2 }
 0x695   : > { %v1381_v11 = vpop.trf.xlu1 }
 0x696   : > { %2478 = vmatmul.msk.bf16.vlgmr.msra.gmra.mxu1 %vm1057_vm10, %v1381_v11 }
 0x6a6   : > { %2484 = vmatmul.msk.bf16.vlgmr.msrb.gmra.mxu1 %vm1012_vm9, %v1657_v63 }
 0x6a9   : > { %v3235_v35 = vpop.f32.mrf.mxu2 }
 0x6aa   : > { %v1494_v25 = vsel %vm1057_vm10, %v3235_v35, -inf }
 0x6b1   : > { %v3237_v14 = vpop.f32.mrf.mxu2 }
 0x6b2   : > { %v1497_v24 = vsel %vm1057_vm10, %v3237_v14, -inf }
 0x6b6   : > { %2485 = vmatmul.msk.bf16.gmra.mxu1 %vm1012_vm9, %v1659_v34 }
 0x6b9   : > { %v3240_v18 = vpop.f32.mrf.mxu2 }
 0x6ba   : > { %v1500_v61 = vsel %vm1057_vm10, %v3240_v18, -inf }
 0x6c1   : > { %v3242_v6 = vpop.f32.mrf.mxu2 }
 0x6c2   : > { %v1503_v59 = vsel %vm1057_vm10, %v3242_v6, -inf }
 0x6c6   : > { %2486 = vmatmul.msk.bf16.gmra.mxu1 %vm1012_vm9, %v1661_v20 }
 0x6c9   : > { %v3245_v54 = vpop.f32.mrf.mxu2 }
 0x6ca   : > { %v1506_v51 = vsel %vm1057_vm10, %v3245_v54, -inf }
 0x6cb   : > { %1507 = vmax.xlane.f32.xlu1 %v1506_v51 }
 0x6d1   : > { %v3249_v23 = vpop.f32.mrf.mxu2 }
 0x6d2   : > { %v1509_v21 = vsel %vm1057_vm10, %v3249_v23, -inf }
 0x6d6   : > { %2487 = vmatmul.msk.bf16.gmra.mxu1 %vm1012_vm9, %v1663_v41 }
 0x6d9   : > { %v1489_v53 = vpop.f32.mrf.mxu2 }
 0x6da   : > { %v1512_v19 = vsel %vm1057_vm10, %v1489_v53, -inf }
 0x6db   : > { %1513 = vmax.xlane.f32.xlu2 %v1512_v19 }
 0x6e1   : > { %v3253_v0 = vpop.f32.mrf.mxu2 }
 0x6e2   : > { %v1515_v13 = vsel %vm1057_vm10, %v3253_v0, -inf }
 0x6e3   : > { %1510 = vmax.xlane.f32.xlu2 %v1509_v21  ;;  %1516 = vmax.xlane.f32.xlu0 %v1515_v13 }
 0x6e4   : > { %1586 = vrot.lane.b32.xlu1 %v3042_v31, %s2702_s30 }
 0x6eb   : > { %1504 = vmax.xlane.f32.xlu2 %v1503_v59  ;;  %1501 = vmax.xlane.f32.xlu0 %v1500_v61 }
 0x6ec   : > { %1802 = vrot.lane.b32.xlu1 %v3042_v31, %s2703_s14 }
 0x6f3   : > { %1498 = vmax.xlane.f32.xlu2 %v1497_v24  ;;  %1495 = vmax.xlane.f32.xlu0 %v1494_v25 }
 0x713   : > { %v1413_v26 = vpop.f32.mrf.mxu1 }
 0x714   : > { %v1418_v15 = vrot.slane %v1413_v26, 1  ;;  %v1419_v27 = vrot.slane %v1413_v26, 2  ;;  %v1420_v28 = vrot.slane %v1413_v26, 3  ;;  %1432 = vst.msk [vmem:[#allocation2 + $0x1] sm:$0x1] %vm1215_vm11, %v1413_v26  ;;  %v1421_v3 = vrot.slane %v1413_v26, 4 }
 0x715   : > { %v1422_v30 = vrot.slane %v1413_v26, 5  ;;  %v1423_v38 = vrot.slane %v1413_v26, 6  ;;  %v1424_v31 = vrot.slane %v1413_v26, 7 }
 0x716   : > { %1433 = vst.msk [vmem:[#allocation2 + $0x5] sm:$0x1] %vm1215_vm11, %v1418_v15 }
 0x717   : > { %1434 = vst.msk [vmem:[#allocation2 + $0x9] sm:$0x1] %vm1215_vm11, %v1419_v27 }
 0x718   : > { %1435 = vst.msk [vmem:[#allocation2 + $0xd] sm:$0x1] %vm1215_vm11, %v1420_v28 }
 0x719   : > { %1436 = vst.msk [vmem:[#allocation2 + $0x11] sm:$0x1] %vm1215_vm11, %v1421_v3 }
 0x71a   : > { %1437 = vst.msk [vmem:[#allocation2 + $0x15] sm:$0x1] %vm1215_vm11, %v1422_v30 }
 0x71b   : > { %1438 = vst.msk [vmem:[#allocation2 + $0x19] sm:$0x1] %vm1215_vm11, %v1423_v38  ;;  %v1415_v16 = vpop.f32.mrf.mxu1 }
 0x71c   : > { %1439 = vst.msk [vmem:[#allocation2 + $0x1d] sm:$0x1] %vm1215_vm11, %v1424_v31 }
 0x723   : > { %v3279_v36 = vpop.f32.mrf.mxu1 }
 0x724   : > { %v1710_v2 = vsel %vm1057_vm10, %v3279_v36, -inf }
 0x72b   : > { %v3281_v17 = vpop.f32.mrf.mxu1 }
 0x72c   : > { %v1713_v41 = vsel %vm1057_vm10, %v3281_v17, -inf }
 0x733   : > { %v3283_v33 = vpop.f32.mrf.mxu1 }
 0x734   : > { %v1716_v8 = vsel %vm1057_vm10, %v3283_v33, -inf }
 0x73b   : > { %v3285_v45 = vpop.f32.mrf.mxu1 }
 0x73c   : > { %v1719_v7 = vsel %vm1057_vm10, %v3285_v45, -inf }
 0x73e   : > { %v1508_v22 = vpop.xlane.xlu1 %1507 }
 0x73f   : > { %v1522_v10 = vsub.f32 %v3245_v54, %v1508_v22 }
 0x741   : > { %v1534_v9 = vmul.f32 1.442695, %v1522_v10 }
 0x743   : > { %v3287_v37 = vpop.f32.mrf.mxu1 }
 0x744   : > { %v1722_v39 = vsel %vm1057_vm10, %v3287_v37, -inf }
 0x745   : > { %1723 = vmax.xlane.f32.xlu0 %v1722_v39 }
 0x74b   : > { %v3291_v40 = vpop.f32.mrf.mxu1 }
 0x74c   : > { %v1725_v46 = vsel %vm1057_vm10, %v3291_v40, -inf }
 0x74d   : > { %1726 = vmax.xlane.f32.xlu2 %v1725_v46 }
 0x74e   : > { %v1514_v29 = vpop.xlane.xlu2 %1513 }
 0x74f   : > { %v1524_v50 = vsub.f32 %v1489_v53, %v1514_v29 }
 0x751   : > { %v1538_v1 = vmul.f32 1.442695, %v1524_v50 }
 0x753   : > { %v3295_v42 = vpop.f32.mrf.mxu1  ;;  %2625 = vpow2.f32 %v1538_v1 }
 0x754   : > { %v1728_v47 = vsel %vm1057_vm10, %v3295_v42, -inf  ;;  %2627 = vpow2.f32 %v1534_v9 }
 0x755   : > { %1729 = vmax.xlane.f32.xlu0 %v1728_v47 }
 0x756   : > { %v1587_v48 = vpop.permute.xlu1 %1586  ;;  %v1517_v49 = vpop.xlane.xlu0 %1516 }
 0x757   : > { %1589 = vxpose.xlu1.c.b16.start.end [1/1] (short) (narrow) %v1587_v48, 16  ;;  %v1525_v5 = vsub.f32 %v3253_v0, %v1517_v49  ;;  %v1511_v52 = vpop.xlane.xlu2 %1510 }
 0x758   : > { %v1523_v20 = vsub.f32 %v3249_v23, %v1511_v52 }
 0x759   : > { %v1540_v63 = vmul.f32 1.442695, %v1525_v5  ;;  %v3311_v34 = vpop.eup %2625 }
 0x75a   : > { %v1560_v51 = vsel %vm1057_vm10, %v3311_v34, 0.0  ;;  %v1536_v53 = vmul.f32 1.442695, %v1523_v20  ;;  %v3319_v21 = vpop.eup %2627 }
 0x75b   : > { %v3299_v60 = vpop.f32.mrf.mxu1  ;;  %2629 = vpow2.f32 %v1540_v63  ;;  %v1554_v24 = vsel %vm1057_vm10, %v3319_v21, 0.0 }
 0x75c   : > { %v1731_v58 = vsel %vm1057_vm10, %v3299_v60, -inf  ;;  %2631 = vpow2.f32 %v1536_v53 }
 0x75d   : > { %1717 = vmax.xlane.f32.xlu0 %v1716_v8  ;;  %1732 = vmax.xlane.f32.xlu2 %v1731_v58 }
 0x75e   : > { %v1502_v11 = vpop.xlane.xlu0 %1501 }
 0x75f   : > { %v1520_v54 = vsub.f32 %v3240_v18, %v1502_v11  ;;  %v1505_v19 = vpop.xlane.xlu2 %1504 }
 0x760   : > { %v1521_v23 = vsub.f32 %v3242_v6, %v1505_v19 }
 0x761   : > { %v1530_v0 = vmul.f32 1.442695, %v1520_v54  ;;  %v3321_v59 = vpop.eup %2629 }
 0x762   : > { %v1563_v61 = vsel %vm1057_vm10, %v3321_v59, 0.0  ;;  %v1532_v25 = vmul.f32 1.442695, %v1521_v23  ;;  %v3329_v15 = vpop.eup %2631 }
 0x763   : > { %2633 = vpow2.f32 %v1530_v0 }
 0x764   : > { %2635 = vpow2.f32 %v1532_v25 }
 0x765   : > { %1711 = vmax.xlane.f32.xlu0 %v1710_v2  ;;  %1720 = vmax.xlane.f32.xlu2 %v1719_v7 }
 0x766   : > { %v1496_v13 = vpop.xlane.xlu0 %1495 }
 0x767   : > { %v1518_v18 = vsub.f32 %v3235_v35, %v1496_v13  ;;  %v1499_v27 = vpop.xlane.xlu2 %1498  ;;  %v1557_v35 = vsel %vm1057_vm10, %v3329_v15, 0.0 }
 0x768   : > { %v1519_v6 = vsub.f32 %v3237_v14, %v1499_v27 }
 0x769   : > { %v1526_v26 = vmul.f32 1.442695, %v1518_v18  ;;  %v3331_v28 = vpop.eup %2633 }
 0x76a   : > { %v1548_v3 = vsel %vm1057_vm10, %v3331_v28, 0.0  ;;  %v1528_v30 = vmul.f32 1.442695, %v1519_v6  ;;  %v3338_v38 = vpop.eup %2635 }
 0x76b   : > { %2637 = vpow2.f32 %v1526_v26  ;;  %v1551_v16 = vsel %vm1057_vm10, %v3338_v38, 0.0 }
 0x76c   : > { %2639 = vpow2.f32 %v1528_v30 }
 0x76d   : > { %1561 = vadd.xlane.f32.xlu0 %v1560_v51  ;;  %1714 = vmax.xlane.f32.xlu2 %v1713_v41 }
 0x771   : > { %v3340_v31 = vpop.eup %2637 }
 0x772   : > { %v1542_v14 = vsel %vm1057_vm10, %v3340_v31, 0.0  ;;  %v3346_v39 = vpop.eup %2639 }
 0x773   : > { %v1545_v46 = vsel %vm1057_vm10, %v3346_v39, 0.0 }
 0x775   : > { %1564 = vadd.xlane.f32.xlu2 %v1563_v61  ;;  %1555 = vadd.xlane.f32.xlu0 %v1554_v24 }
 0x77d   : > { %1558 = vadd.xlane.f32.xlu2 %v1557_v35  ;;  %1549 = vadd.xlane.f32.xlu0 %v1548_v3 }
 0x785   : > { %1552 = vadd.xlane.f32.xlu2 %v1551_v16  ;;  %1543 = vadd.xlane.f32.xlu0 %v1542_v14 }
 0x78d   : > { %1546 = vadd.xlane.f32.xlu2 %v1545_v46 }
 0x7b8   : > { %v1724_v22 = vpop.xlane.xlu0 %1723 }
 0x7b9   : > { %v1738_v50 = vsub.f32 %v3287_v37, %v1724_v22 }
 0x7bb   : > { %v1750_v8 = vmul.f32 1.442695, %v1738_v50 }
 0x7c0   : > { %v1727_v47 = vpop.xlane.xlu2 %1726 }
 0x7c1   : > { %v1739_v7 = vsub.f32 %v3291_v40, %v1727_v47 }
 0x7c3   : > { %v1752_v9 = vmul.f32 1.442695, %v1739_v7 }
 0x7c8   : > { %v1730_v48 = vpop.xlane.xlu0 %1729 }
 0x7c9   : > { %v1740_v29 = vsub.f32 %v3295_v42, %v1730_v48 }
 0x7cb   : > { %v1754_v49 = vmul.f32 1.442695, %v1740_v29 }
 0x7cd   : > { %2641 = vpow2.f32 %v1754_v49 }
 0x7ce   : > { %2643 = vpow2.f32 %v1750_v8 }
 0x7d0   : > { %v1718_v58 = vpop.xlane.xlu0 %1717  ;;  %v1733_v1 = vpop.xlane.xlu2 %1732 }
 0x7d1   : > { %v1741_v10 = vsub.f32 %v3299_v60, %v1733_v1  ;;  %v1736_v52 = vsub.f32 %v3283_v33, %v1718_v58 }
 0x7d3   : > { %v3353_v5 = vpop.eup %2641  ;;  %v1756_v2 = vmul.f32 1.442695, %v1741_v10  ;;  %v1746_v37 = vmul.f32 1.442695, %v1736_v52 }
 0x7d4   : > { %v1776_v42 = vsel %vm1057_vm10, %v3353_v5, 0.0  ;;  %v3359_v20 = vpop.eup %2643 }
 0x7d5   : > { %1777 = vadd.xlane.f32.xlu0 %v1776_v42  ;;  %2645 = vpow2.f32 %v1756_v2  ;;  %v1770_v40 = vsel %vm1057_vm10, %v3359_v20, 0.0 }
 0x7d6   : > { %2647 = vpow2.f32 %v1746_v37 }
 0x7d7   : > { %2649 = vpow2.f32 %v1752_v9 }
 0x7d8   : > { %v1712_v11 = vpop.xlane.xlu0 %1711  ;;  %v1721_v63 = vpop.xlane.xlu2 %1720 }
 0x7d9   : > { %v1734_v60 = vsub.f32 %v3279_v36, %v1712_v11  ;;  %v1737_v33 = vsub.f32 %v3285_v45, %v1721_v63 }
 0x7db   : > { %v3362_v54 = vpop.eup %2645  ;;  %v1742_v41 = vmul.f32 1.442695, %v1734_v60  ;;  %v1748_v53 = vmul.f32 1.442695, %v1737_v33 }
 0x7dc   : > { %v1779_v51 = vsel %vm1057_vm10, %v3362_v54, 0.0  ;;  %v3369_v13 = vpop.eup %2647 }
 0x7dd   : > { %1771 = vadd.xlane.f32.xlu0 %v1770_v40  ;;  %1780 = vadd.xlane.f32.xlu2 %v1779_v51  ;;  %v3371_v36 = vpop.eup %2649  ;;  %2651 = vpow2.f32 %v1742_v41  ;;  %v1764_v23 = vsel %vm1057_vm10, %v3369_v13, 0.0  ;;  %v1803_v51 = vpop.permute.xlu1 %1802 }
 0x7de   : > { %2653 = vpow2.f32 %v1748_v53  ;;  %v1773_v18 = vsel %vm1057_vm10, %v3371_v36, 0.0 }
 0x7e0   : > { %v1562_v19 = vpop.xlane.xlu0 %1561  ;;  %v1715_v0 = vpop.xlane.xlu2 %1714 }
 0x7e1   : > { %v1735_v45 = vsub.f32 %v3281_v17, %v1715_v0  ;;  %2655 = vrcp.f32 %v1562_v19 }
 0x7e3   : > { %v1744_v61 = vmul.f32 1.442695, %v1735_v45  ;;  %v3378_v26 = vpop.eup %2651 }
 0x7e4   : > { %v3380_v27 = vpop.eup %2653  ;;  %v1758_v17 = vsel %vm1057_vm10, %v3378_v26, 0.0 }
 0x7e5   : > { %1765 = vadd.xlane.f32.xlu0 %v1764_v23  ;;  %1774 = vadd.xlane.f32.xlu2 %v1773_v18  ;;  %v1767_v35 = vsel %vm1057_vm10, %v3380_v27, 0.0 }
 0x7e7   : > { %v2656_v6 = vpop.eup %2655 }
 0x7e8   : > { %v1565_v24 = vpop.xlane.xlu2 %1564  ;;  %v1556_v25 = vpop.xlane.xlu0 %1555  ;;  %v1580_v16 = vmul.f32 %v2656_v6, %v3311_v34 }
 0x7e9   : > { %2657 = vrcp.f32 %v1565_v24 }
 0x7ea   : > { %2659 = vpow2.f32 %v1744_v61 }
 0x7eb   : > { %2661 = vrcp.f32 %v1556_v25 }
 0x7ed   : > { %1759 = vadd.xlane.f32.xlu0 %v1758_v17  ;;  %1768 = vadd.xlane.f32.xlu2 %v1767_v35 }
 0x7ef   : > { %v2658_v3 = vpop.eup %2657 }
 0x7f0   : > { %v1559_v30 = vpop.xlane.xlu2 %1558  ;;  %v1581_v14 = vmul.f32 %v2658_v3, %v3321_v59  ;;  %v3388_v46 = vpop.eup %2659 }
 0x7f1   : > { %2663 = vrcp.f32 %v1559_v30  ;;  %v1550_v22 = vpop.xlane.xlu0 %1549  ;;  %v2662_v29 = vpop.eup %2661  ;;  %v1761_v50 = vsel %vm1057_vm10, %v3388_v46, 0.0 }
 0x7f2   : > { %v1585_v47 = vpack.c.bf16 %v1581_v14, %v1580_v16  ;;  %2665 = vrcp.f32 %v1550_v22  ;;  %v1578_v34 = vmul.f32 %v2662_v29, %v3319_v21 }
 0x7f4   : > { %v1618_v48 = vsel %vm1057_vm10, %v1585_v47, 0 }
 0x7f5   : > { %1624 = vmatpush.bf16.xpose.msra.mxu3 %v1618_v48  ;;  %1762 = vadd.xlane.f32.xlu2 %v1761_v50 }
 0x7f7   : > { %v2664_v49 = vpop.eup %2663 }
 0x7f8   : > { %v1553_v8 = vpop.xlane.xlu2 %1552  ;;  %v1579_v59 = vmul.f32 %v2664_v49, %v3329_v15  ;;  %v2666_v52 = vpop.eup %2665 }
 0x7f9   : > { %2667 = vrcp.f32 %v1553_v8  ;;  %v1544_v1 = vpop.xlane.xlu0 %1543  ;;  %v1576_v42 = vmul.f32 %v2666_v52, %v3331_v28 }
 0x7fa   : > { %v1584_v58 = vpack.c.bf16 %v1579_v59, %v1578_v34  ;;  %2669 = vrcp.f32 %v1544_v1 }
 0x7fc   : > { %v1615_v10 = vsel %vm1057_vm10, %v1584_v58, 0 }
 0x7fd   : > { %1625 = vmatpush.bf16.xpose.msra.mxu3 %v1615_v10 }
 0x7ff   : > { %v2668_v2 = vpop.eup %2667 }
 0x800   : > { %v1547_v7 = vpop.xlane.xlu2 %1546  ;;  %v1577_v37 = vmul.f32 %v2668_v2, %v3338_v38  ;;  %v2670_v11 = vpop.eup %2669 }
 0x801   : > { %2671 = vrcp.f32 %v1547_v7  ;;  %v1574_v63 = vmul.f32 %v2670_v11, %v3340_v31 }
 0x802   : > { %v1583_v9 = vpack.c.bf16 %v1577_v37, %v1576_v42 }
 0x803   : > { %v1597_v19 = vpop.trf.xlu1 }
 0x804   : > { %v1612_v21 = vsel %vm1057_vm10, %v1583_v9, 0 }
 0x805   : > { %1626 = vmatpush.bf16.xpose.msra.mxu3 %v1612_v21 }
 0x807   : > { %v2672_v15 = vpop.eup %2671 }
 0x808   : > { %v1575_v60 = vmul.f32 %v2672_v15, %v3346_v39 }
 0x80a   : > { %v1582_v33 = vpack.c.bf16 %v1575_v60, %v1574_v63 }
 0x80c   : > { %v1609_v40 = vsel %vm1057_vm10, %v1582_v33, 0 }
 0x80d   : > { %1627 = vmatpush.bf16.xpose.msra.mxu3 %v1609_v40 }
 0x814   : > { %2483 = vmatmul.msk.bf16.vlgmr.msra.gmra.mxu3 %vm1057_vm10, %v1597_v19 }
 0x816   : > { %1805 = vxpose.xlu0.c.b16.start.end [1/1] (short) (narrow) %v1803_v51, 16 }
 0x848   : > { %v1778_v28 = vpop.xlane.xlu0 %1777 }
 0x849   : > { %2673 = vrcp.f32 %v1778_v28 }
 0x84f   : > { %v2674_v53 = vpop.eup %2673 }
 0x850   : > { %v1781_v38 = vpop.xlane.xlu2 %1780  ;;  %v1772_v41 = vpop.xlane.xlu0 %1771  ;;  %v1796_v39 = vmul.f32 %v2674_v53, %v3353_v5 }
 0x851   : > { %2675 = vrcp.f32 %v1781_v38 }
 0x852   : > { %2677 = vrcp.f32 %v1772_v41 }
 0x857   : > { %v2676_v0 = vpop.eup %2675 }
 0x858   : > { %v1775_v31 = vpop.xlane.xlu2 %1774  ;;  %v1797_v45 = vmul.f32 %v2676_v0, %v3362_v54  ;;  %v1766_v23 = vpop.xlane.xlu0 %1765 }
 0x859   : > { %2679 = vrcp.f32 %v1775_v31  ;;  %v2678_v24 = vpop.eup %2677 }
 0x85a   : > { %v1801_v18 = vpack.c.bf16 %v1797_v45, %v1796_v39  ;;  %2681 = vrcp.f32 %v1766_v23  ;;  %v1794_v6 = vmul.f32 %v2678_v24, %v3359_v20 }
 0x85c   : > { %v1834_v61 = vsel %vm1057_vm10, %v1801_v18, 0 }
 0x85d   : > { %1840 = vmatpush.bf16.xpose.msrb.mxu3 %v1834_v61 }
 0x85f   : > { %v2680_v25 = vpop.eup %2679 }
 0x860   : > { %v1769_v17 = vpop.xlane.xlu2 %1768  ;;  %v1795_v35 = vmul.f32 %v2680_v25, %v3371_v36  ;;  %v1760_v30 = vpop.xlane.xlu0 %1759 }
 0x861   : > { %2683 = vrcp.f32 %v1769_v17  ;;  %v2682_v54 = vpop.eup %2681 }
 0x862   : > { %v1800_v3 = vpack.c.bf16 %v1795_v35, %v1794_v6  ;;  %2685 = vrcp.f32 %v1760_v30  ;;  %v1792_v22 = vmul.f32 %v2682_v54, %v3369_v13 }
 0x864   : > { %v1831_v5 = vsel %vm1057_vm10, %v1800_v3, 0 }
 0x865   : > { %1841 = vmatpush.bf16.xpose.msrb.mxu3 %v1831_v5 }
 0x867   : > { %v2684_v16 = vpop.eup %2683 }
 0x868   : > { %v1763_v14 = vpop.xlane.xlu2 %1762  ;;  %v1793_v47 = vmul.f32 %v2684_v16, %v3380_v27  ;;  %v2686_v29 = vpop.eup %2685 }
 0x869   : > { %2687 = vrcp.f32 %v1763_v14  ;;  %v1790_v50 = vmul.f32 %v2686_v29, %v3378_v26 }
 0x86a   : > { %v1799_v48 = vpack.c.bf16 %v1793_v47, %v1792_v22 }
 0x86c   : > { %v1828_v20 = vsel %vm1057_vm10, %v1799_v48, 0 }
 0x86d   : > { %1842 = vmatpush.bf16.xpose.msrb.mxu3 %v1828_v20 }
 0x86f   : > { %v2688_v36 = vpop.eup %2687 }
 0x870   : > { %v1791_v49 = vmul.f32 %v2688_v36, %v3388_v46 }
 0x872   : > { %v1798_v8 = vpack.c.bf16 %v1791_v49, %v1790_v50 }
 0x874   : > { %v1825_v34 = vsel %vm1057_vm10, %v1798_v8, 0 }
 0x875   : > { %1843 = vmatpush.bf16.xpose.msrb.mxu3 %v1825_v34 }
 0x897   : > { %v1629_v13 = vpop.f32.mrf.mxu3 }
 0x898   : > { %v1634_v27 = vrot.slane %v1629_v13, 1  ;;  %v1635_v58 = vrot.slane %v1629_v13, 2  ;;  %v1636_v1 = vrot.slane %v1629_v13, 3  ;;  %1648 = vst.msk [vmem:[#allocation2 + $0x2] sm:$0x1] %vm1215_vm11, %v1629_v13  ;;  %v1637_v10 = vrot.slane %v1629_v13, 4 }
 0x899   : > { %v1638_v52 = vrot.slane %v1629_v13, 5  ;;  %v1639_v26 = vrot.slane %v1629_v13, 6  ;;  %v1640_v46 = vrot.slane %v1629_v13, 7 }
 0x89a   : > { %1649 = vst.msk [vmem:[#allocation2 + $0x6] sm:$0x1] %vm1215_vm11, %v1634_v27 }
 0x89b   : > { %1650 = vst.msk [vmem:[#allocation2 + $0xa] sm:$0x1] %vm1215_vm11, %v1635_v58 }
 0x89c   : > { %1651 = vst.msk [vmem:[#allocation2 + $0xe] sm:$0x1] %vm1215_vm11, %v1636_v1 }
 0x89d   : > { %1652 = vst.msk [vmem:[#allocation2 + $0x12] sm:$0x1] %vm1215_vm11, %v1637_v10 }
 0x89e   : > { %1653 = vst.msk [vmem:[#allocation2 + $0x16] sm:$0x1] %vm1215_vm11, %v1638_v52 }
 0x89f   : > { %1654 = vst.msk [vmem:[#allocation2 + $0x1a] sm:$0x1] %vm1215_vm11, %v1639_v26  ;;  %v1631_v2 = vpop.f32.mrf.mxu3 }
 0x8a0   : > { %1655 = vst.msk [vmem:[#allocation2 + $0x1e] sm:$0x1] %vm1215_vm11, %v1640_v46 }
 0x8c2   : > { %v1813_v59 = vpop.trf.xlu0 }
 0x8c3   : > { %2488 = vmatmul.msk.bf16.vlgmr.msrb.gmra.mxu3 %vm1057_vm10, %v1813_v59 }
 0x946   : > { %v1845_v7 = vpop.f32.mrf.mxu3 }
 0x947   : > { %v1850_v42 = vrot.slane %v1845_v7, 1  ;;  %v1851_v37 = vrot.slane %v1845_v7, 2  ;;  %v1852_v9 = vrot.slane %v1845_v7, 3  ;;  %1864 = vst.msk [vmem:[#allocation2 + $0x3] sm:$0x1] %vm1215_vm11, %v1845_v7  ;;  %v1853_v21 = vrot.slane %v1845_v7, 4 }
 0x948   : > { %v1854_v11 = vrot.slane %v1845_v7, 5  ;;  %v1855_v15 = vrot.slane %v1845_v7, 6  ;;  %v1856_v63 = vrot.slane %v1845_v7, 7 }
 0x949   : > { %1865 = vst.msk [vmem:[#allocation2 + $0x7] sm:$0x1] %vm1215_vm11, %v1850_v42 }
 0x94a   : > { %1866 = vst.msk [vmem:[#allocation2 + $0xb] sm:$0x1] %vm1215_vm11, %v1851_v37 }
 0x94b   : > { %1867 = vst.msk [vmem:[#allocation2 + $0xf] sm:$0x1] %vm1215_vm11, %v1852_v9 }
 0x94c   : > { %1868 = vst.msk [vmem:[#allocation2 + $0x13] sm:$0x1] %vm1215_vm11, %v1853_v21 }
 0x94d   : > { %1869 = vst.msk [vmem:[#allocation2 + $0x17] sm:$0x1] %vm1215_vm11, %v1854_v11 }
 0x94e   : > { %1870 = vst.msk [vmem:[#allocation2 + $0x1b] sm:$0x1] %vm1215_vm11, %v1855_v15  ;;  %v1847_v60 = vpop.f32.mrf.mxu3  ;;  %v1872_v33 = vld [vmem:[#allocation2] sm:$0xf] }
 0x94f   : > { %1871 = vst.msk [vmem:[#allocation2 + $0x1f] sm:$0x1] %vm1215_vm11, %v1856_v63  ;;  %v1888_v40 = vrot.slane %v1872_v33, 3 }
 0x950   : > { %v3432_v51 = vld [vmem:[#allocation2 + $0x4] sm:$0xf] }
 0x951   : > { %v3435_v28 = vsel %vm1896_vm12, %v1872_v33, %v1888_v40  ;;  %v1889_v38 = vrot.slane %v3432_v51, 3  ;;  %v3448_v0 = vsel %vm1898_vm13, %v1872_v33, %v1888_v40  ;;  %v3471_v5 = vsel %vm1901_vm14, %v1872_v33, %v1888_v40 }
 0x952   : > { %v1988_v41 = vperm.slane %v3435_v28, 0  ;;  %v1900_v61 = vrot.slane %v3448_v0, 1  ;;  %v3465_v3 = vld [vmem:[#allocation2 + $0xc] sm:$0xf]  ;;  %v1903_v48 = vrot.slane %v3471_v5, 2  ;;  %v3509_v59 = vsel %vm1904_vm15, %v1872_v33, %v1888_v40 }
 0x953   : > { %v3441_v53 = vsel %vm1896_vm12, %v3432_v51, %v1889_v38  ;;  %v3445_v19 = vsel %vm1901_vm14, %v3432_v51, %v1889_v38  ;;  %v3458_v17 = vld [vmem:[#allocation2 + $0x10] sm:$0xf]  ;;  %v3482_v22 = vrot.slane %v3465_v3, 3  ;;  %v3494_v29 = vsel %vm1904_vm15, %v3432_v51, %v1889_v38 }
 0x954   : > { %2020 = vrot.lane.b32.xlu2 %v1988_v41, %s2697_s18  ;;  %v1992_v31 = vperm.slane %v3441_v53, 0  ;;  %v1911_v39 = vrot.slane %v3445_v19, 2  ;;  %v1877_v45 = vld [vmem:[#allocation2 + $0x14] sm:$0xf]  ;;  %v1989_v35 = vperm.slane %v1900_v61, 0  ;;  %v3474_v54 = vrot.slane %v3458_v17, 3 }
 0x955   : > { %v1878_v23 = vld [vmem:[#allocation2 + $0x18] sm:$0xf]  ;;  %v1893_v25 = vrot.slane %v1877_v45, 3  ;;  %v3503_v49 = vsel %vm1901_vm14, %v3465_v3, %v3482_v22  ;;  %v1990_v8 = vperm.slane %v1903_v48, 0  ;;  %v3515_v27 = vsel %vm1904_vm15, %v3465_v3, %v3482_v22  ;;  %v2516_v19 = vld [vmem:[%s3853_s6 + $0x8] sm:$0xff] }
 0x956   : > { %2028 = vrot.lane.b32.xlu0 %v1992_v31, %s2697_s18  ;;  %v1994_v18 = vperm.slane %v1911_v39, 0  ;;  %v1894_v24 = vrot.slane %v1878_v23, 3  ;;  %v3490_v20 = vsel %vm1901_vm14, %v3458_v17, %v3474_v54  ;;  %v3498_v50 = vld [vmem:[#allocation2 + $0x1c] sm:$0xf]  ;;  %v3520_v58 = vsel %vm1898_vm13, %v3458_v17, %v3474_v54  ;;  %2277 = vmatpush.bf16.msrb.mxu0 %v2516_v19 }
 0x957   : > { %v3468_v30 = vsel %vm1896_vm12, %v1877_v45, %v1893_v25  ;;  %v3479_v14 = vsel %vm1898_vm13, %v1877_v45, %v1893_v25  ;;  %v1932_v34 = vrot.slane %v3490_v20, 2  ;;  %v1895_v13 = vrot.slane %v3498_v50, 3 }
 0x958   : > { %2032 = vrot.lane.b32.xlu1 %v1994_v18, %s2697_s18  ;;  %v3461_v6 = vsel %vm1896_vm12, %v1878_v23, %v1894_v24  ;;  %v2008_v47 = vperm.slane %v3468_v30, 0  ;;  %v1937_v36 = vrot.slane %v3479_v14, 1  ;;  %v3526_v10 = vsel %vm1904_vm15, %v1878_v23, %v1894_v24 }
 0x959   : > { %v2012_v16 = vperm.slane %v3461_v6, 0  ;;  %v3531_v52 = vsel %vm1904_vm15, %v3458_v17, %v3474_v54  ;;  %v3534_v26 = vsel %vm1901_vm14, %v1877_v45, %v1893_v25  ;;  %v3537_v46 = vsel %vm1898_vm13, %v1878_v23, %v1894_v24 }
 0x95a   : > { %v2009_v1 = vperm.slane %v1937_v36, 0  ;;  %v2006_v2 = vperm.slane %v1932_v34, 0  ;;  %v1906_v7 = vrot.slane %v3509_v59, 3  ;;  %v3544_v42 = vsel %vm1904_vm15, %v1877_v45, %v1893_v25 }
 0x95b   : > { %v3548_v37 = vsel %vm1904_vm15, %v3498_v50, %v1895_v13  ;;  %v1948_v9 = vrot.slane %v3526_v10, 3  ;;  %v1941_v11 = vrot.slane %v3544_v42, 3  ;;  %v3557_v15 = vsel %vm1898_vm13, %v3432_v51, %v1889_v38  ;;  %v1874_v38 = vld [vmem:[#allocation2 + $0x8] sm:$0xf] }
 0x95c   : > { %2022 = vrot.lane.b32.xlu2 %v1989_v35, %s2697_s18  ;;  %v1991_v21 = vperm.slane %v1906_v7, 0  ;;  %v3564_v60 = vsel %vm1901_vm14, %v3498_v50, %v1895_v13  ;;  %v1909_v40 = vrot.slane %v3557_v15, 1  ;;  %v3571_v41 = vsel %vm1901_vm14, %v1878_v23, %v1894_v24 }
 0x95d   : > { %v2015_v63 = vperm.slane %v1948_v9, 0  ;;  %v2011_v33 = vperm.slane %v1941_v11, 0  ;;  %v1953_v51 = vrot.slane %v3564_v60, 2  ;;  %v1946_v45 = vrot.slane %v3571_v41, 2  ;;  %v2540_v60 = vld [vmem:[%s3854_s7] ss:$0 sm:$0xff] }
 0x95e   : > { %2068 = vrot.lane.b32.xlu0 %v2012_v16, %s2697_s18  ;;  %v1993_v31 = vperm.slane %v1909_v40, 0  ;;  %v1890_v18 = vrot.slane %v1874_v38, 3  ;;  %v3589_v35 = vsel %vm1898_vm13, %v3498_v50, %v1895_v13 }
 0x95f   : > { %v2018_v25 = vperm.slane %v1953_v51, 0  ;;  %v2014_v23 = vperm.slane %v1946_v45, 0 }
 0x960   : > { %2060 = vrot.lane.b32.xlu1 %v2008_v47, %s2697_s18  ;;  %v3585_v24 = vsel %vm1896_vm12, %v1874_v38, %v1890_v18  ;;  %v1951_v47 = vrot.slane %v3589_v35, 1 }
 0x961   : > { %v1996_v16 = vperm.slane %v3585_v24, 0 }
 0x964   : > { %2024 = vrot.lane.b32.xlu2 %v1990_v8, %s2697_s18  ;;  %v990_v8 = vadd.f32 %v3209_v56, %v3201_v43  ;;  %v998_v43 = vadd.f32 %v3209_v56, %v3222_v55  ;;  %v995_v55 = vadd.f32 %v3209_v56, %v3218_v4 }
 0x966   : > { %2062 = vrot.lane.b32.xlu0 %v2009_v1, %s2697_s18  ;;  %v2017_v1 = vperm.slane %v1951_v47, 0 }
 0x968   : > { %2056 = vrot.lane.b32.xlu1 %v2006_v2, %s2697_s18  ;;  %v3603_v2 = vsel %vm1896_vm12, %v3465_v3, %v3482_v22 }
 0x96c   : > { %2026 = vrot.lane.b32.xlu2 %v1991_v21, %s2697_s18  ;;  %v2000_v21 = vperm.slane %v3603_v2, 0 }
 0x96e   : > { %2074 = vrot.lane.b32.xlu0 %v2015_v63, %s2697_s18  ;;  %v988_v63 = vadd.f32 %v3209_v56, %v3195_v32  ;;  %v3628_v32 = vsel %vm1896_vm12, %v3498_v50, %v1895_v13 }
 0x970   : > { %2066 = vrot.lane.b32.xlu1 %v2011_v33, %s2697_s18  ;;  %v3616_v33 = vsel %vm1896_vm12, %v3458_v17, %v3474_v54  ;;  %v2016_v17 = vperm.slane %v3628_v32, 0  ;;  %v1913_v54 = vrot.slane %v3494_v29, 3 }
 0x972   : > { %v1995_v4 = vperm.slane %v1913_v54, 0 }
 0x974   : > { %2030 = vrot.lane.b32.xlu2 %v1993_v31, %s2697_s18  ;;  %v2004_v31 = vperm.slane %v3616_v33, 0 }
 0x976   : > { %2080 = vrot.lane.b32.xlu0 %v2018_v25, %s2697_s18  ;;  %v1005_v25 = vadd.f32 %v3209_v56, %v3232_v44  ;;  %v1003_v44 = vadd.f32 %v3209_v56, %v3230_v12 }
 0x978   : > { %2072 = vrot.lane.b32.xlu1 %v2014_v23, %s2697_s18  ;;  %v3640_v23 = vsel %vm1898_vm13, %v1874_v38, %v1890_v18 }
 0x979   : > { %v1916_v50 = vrot.slane %v3640_v23, 1 }
 0x97b   : > { %v1997_v13 = vperm.slane %v1916_v50, 0 }
 0x97c   : > { %2036 = vrot.lane.b32.xlu2 %v1996_v16, %s2697_s18  ;;  %v3647_v16 = vsel %vm1901_vm14, %v1874_v38, %v1890_v18 }
 0x97d   : > { %v1918_v56 = vrot.slane %v3647_v16, 2 }
 0x97e   : > { %2318 = vrot.lane.b32.xlu0 %v990_v8, %s2704_s17  ;;  %v3654_v8 = vsel %vm1904_vm15, %v1874_v38, %v1890_v18 }
 0x97f   : > { %v1998_v12 = vperm.slane %v1918_v56, 0 }
 0x980   : > { %2078 = vrot.lane.b32.xlu1 %v2017_v1, %s2697_s18 }
 0x984   : > { %2044 = vrot.lane.b32.xlu2 %v2000_v21, %s2697_s18  ;;  %v1920_v21 = vrot.slane %v3654_v8, 3 }
 0x986   : > { %2324 = vrot.lane.b32.xlu0 %v998_v43, %s2704_s17 }
 0x988   : > { %2316 = vrot.lane.b32.xlu1 %v988_v63, %s2704_s17  ;;  %v1999_v63 = vperm.slane %v1920_v21, 0 }
 0x98c   : > { %2052 = vrot.lane.b32.xlu2 %v2004_v31, %s2697_s18  ;;  %v3665_v31 = vsel %vm1898_vm13, %v3465_v3, %v3482_v22 }
 0x98d   : > { %v1923_v18 = vrot.slane %v3665_v31, 1 }
 0x98e   : > { %2330 = vrot.lane.b32.xlu0 %v1005_v25, %s2704_s17 }
 0x990   : > { %2322 = vrot.lane.b32.xlu1 %v995_v55, %s2704_s17 }
 0x994   : > { %2076 = vrot.lane.b32.xlu2 %v2016_v17, %s2697_s18  ;;  %v1925_v17 = vrot.slane %v3503_v49, 2 }
 0x996   : > { %v2002_v22 = vperm.slane %v1925_v17, 0 }
 0x998   : > { %2328 = vrot.lane.b32.xlu1 %v1003_v44, %s2704_s17 }
 0x99c   : > { %2034 = vrot.lane.b32.xlu2 %v1995_v4, %s2697_s18 }
 0x9a4   : > { %2038 = vrot.lane.b32.xlu2 %v1997_v13, %s2697_s18 }
 0x9ac   : > { %2040 = vrot.lane.b32.xlu2 %v1998_v12, %s2697_s18 }
 0x9ae   : > { %v2021_v1 = vpop.permute.xlu2 %2020 }
 0x9af   : > { %v2116_v43 = vsel %vm1896_vm12, %v3435_v28, %v2021_v1  ;;  %v2001_v28 = vperm.slane %v1923_v18, 0 }
 0x9b0   : > { %2180 = vst [vmem:[#allocation1] ss:$4 sm:$0xff] %v2116_v43  ;;  %v1934_v43 = vrot.slane %v3531_v52, 3 }
 0x9b4   : > { %2042 = vrot.lane.b32.xlu2 %v1999_v63, %s2697_s18 }
 0x9b6   : > { %v2023_v38 = vpop.permute.xlu2 %2022 }
 0x9b7   : > { %v2117_v25 = vsel %vm1896_vm12, %v1900_v61, %v2023_v38  ;;  %v1927_v61 = vrot.slane %v3515_v27, 3 }
 0x9b8   : > { %2182 = vst [vmem:[#allocation1 + $0x1] ss:$4 sm:$0xff] %v2117_v25  ;;  %v1939_v25 = vrot.slane %v3534_v26, 2 }
 0x9b9   : > { %v2003_v13 = vperm.slane %v1927_v61, 0 }
 0x9bc   : > { %2046 = vrot.lane.b32.xlu2 %v2001_v28, %s2697_s18  ;;  %v2515_v28 = vld [vmem:[%s3853_s6] sm:$0xff] }
 0x9bd   : > { %2278 = vmatpush.bf16.msrb.mxu0 %v2515_v28 }
 0x9be   : > { %v2025_v55 = vpop.permute.xlu2 %2024 }
 0x9bf   : > { %v2118_v3 = vsel %vm1896_vm12, %v1903_v48, %v2025_v55  ;;  %v2010_v55 = vperm.slane %v1939_v25, 0 }
 0x9c0   : > { %2184 = vst [vmem:[#allocation1 + $0x2] ss:$4 sm:$0xff] %v2118_v3  ;;  %v1944_v3 = vrot.slane %v3537_v46, 1 }
 0x9c4   : > { %2048 = vrot.lane.b32.xlu2 %v2002_v22, %s2697_s18  ;;  %v2013_v22 = vperm.slane %v1944_v3, 0 }
 0x9c6   : > { %v2027_v0 = vpop.permute.xlu2 %2026 }
 0x9c7   : > { %v2119_v44 = vsel %vm1896_vm12, %v1906_v7, %v2027_v0  ;;  %v1930_v7 = vrot.slane %v3520_v58, 1 }
 0x9c8   : > { %2186 = vst [vmem:[#allocation1 + $0x3] ss:$4 sm:$0xff] %v2119_v44  ;;  %v2029_v4 = vpop.permute.xlu0 %2028  ;;  %v1955_v44 = vrot.slane %v3548_v37, 3 }
 0x9c9   : > { %v2120_v5 = vsel %vm1896_vm12, %v3441_v53, %v2029_v4  ;;  %v2005_v53 = vperm.slane %v1930_v7, 0 }
 0x9ca   : > { %2188 = vst [vmem:[#allocation1 + $0x20] ss:$4 sm:$0xff] %v2120_v5  ;;  %v2033_v48 = vpop.permute.xlu1 %2032  ;;  %v2019_v4 = vperm.slane %v1955_v44, 0 }
 0x9cb   : > { %v2122_v12 = vsel %vm1896_vm12, %v1911_v39, %v2033_v48 }
 0x9cc   : > { %2192 = vst [vmem:[#allocation1 + $0x22] ss:$4 sm:$0xff] %v2122_v12  ;;  %2050 = vrot.lane.b32.xlu2 %v2003_v13, %s2697_s18 }
 0x9ce   : > { %v2031_v59 = vpop.permute.xlu2 %2030 }
 0x9cf   : > { %v2121_v1 = vsel %vm1896_vm12, %v1909_v40, %v2031_v59  ;;  %v2195_v63 = vld.sshfl [vmem:[#allocation1] sm:$0xff pattern:$0x73625140]  ;;  %v2007_v40 = vperm.slane %v1934_v43, 0 }
 0x9d0   : > { %2190 = vst [vmem:[#allocation1 + $0x21] ss:$4 sm:$0xff] %v2121_v1  ;;  %v2069_v31 = vpop.permute.xlu0 %2068 }
 0x9d1   : > { %v2140_v28 = vsel %vm1896_vm12, %v3461_v6, %v2069_v31 }
 0x9d4   : > { %2054 = vrot.lane.b32.xlu2 %v2005_v53, %s2697_s18 }
 0x9d6   : > { %v2037_v39 = vpop.permute.xlu2 %2036 }
 0x9d7   : > { %v2124_v15 = vsel %vm1896_vm12, %v3585_v24, %v2037_v39 }
 0x9d8   : > { %2197 = vst [vmem:[#allocation1] ss:$4 sm:$0xff] %v2124_v15  ;;  %v2063_v15 = vpop.permute.xlu0 %2062 }
 0x9dc   : > { %2058 = vrot.lane.b32.xlu2 %v2007_v40, %s2697_s18 }
 0x9de   : > { %v2045_v38 = vpop.permute.xlu2 %2044 }
 0x9df   : > { %v2128_v12 = vsel %vm1896_vm12, %v3603_v2, %v2045_v38  ;;  %v2061_v2 = vpop.permute.xlu1 %2060 }
 0x9e0   : > { %v2136_v49 = vsel %vm1896_vm12, %v3468_v30, %v2061_v2  ;;  %v2075_v58 = vpop.permute.xlu0 %2074 }
 0x9e1   : > { %v2143_v52 = vsel %vm1896_vm12, %v1948_v9, %v2075_v58 }
 0x9e4   : > { %2064 = vrot.lane.b32.xlu2 %v2010_v55, %s2697_s18 }
 0x9e6   : > { %v2053_v24 = vpop.permute.xlu2 %2052 }
 0x9e7   : > { %v2132_v16 = vsel %vm1896_vm12, %v3616_v33, %v2053_v24 }
 0x9e8   : > { %v2081_v55 = vpop.permute.xlu0 %2080 }
 0x9e9   : > { %v2146_v9 = vsel %vm1896_vm12, %v1953_v51, %v2081_v55 }
 0x9ec   : > { %2070 = vrot.lane.b32.xlu2 %v2013_v22, %s2697_s18 }
 0x9ee   : > { %v3721_v0 = vpop.permute.xlu2 %2076 }
 0x9f4   : > { %2082 = vrot.lane.b32.xlu2 %v2019_v4, %s2697_s18  ;;  %s2504_s18 = sshll.u32 %s3862_s26, 6 }
 0x9f5   : > { %s3810_s29 = scalar_lea.vmem %s3860_s13, %s2504_s18 }
 0x9f6   : > { %v2035_v5 = vpop.permute.xlu2 %2034 }
 0x9f7   : > { %v2123_v48 = vsel %vm1896_vm12, %v1913_v54, %v2035_v5 }
 0x9f8   : > { %2194 = vst [vmem:[#allocation1 + $0x23] ss:$4 sm:$0xff] %v2123_v48 }
 0x9fc   : > { %2320 = vrot.lane.b32.xlu2 %v3214_v62, %s2704_s17 }
 0x9fe   : > { %v2039_v13 = vpop.permute.xlu2 %2038 }
 0x9ff   : > { %v2196_v59 = vld.sshfl [vmem:[#allocation1 + $0x20] sm:$0xff pattern:$0x73625140]  ;;  %v2125_v1 = vsel %vm1896_vm12, %v1916_v50, %v2039_v13  ;;  %v2057_v50 = vpop.permute.xlu1 %2056 }
 0xa00   : > { %2201 = vst [vmem:[#allocation1 + $0x20] ss:$4 sm:$0xff] %v2128_v12  ;;  %v2235_v53 = vpack.c.bf16 %v2196_v59, %v2195_v63 }
 0xa01   : > { %2198 = vst [vmem:[#allocation1 + $0x1] ss:$4 sm:$0xff] %v2125_v1 }
 0xa02   : > { %2497 = vmatmul.msk.bf16.vlgmr.msrb.gmra.mxu0 %vm486_vm0, %v2235_v53 }
 0xa04   : > { %2326 = vrot.lane.b32.xlu2 %v3226_v57, %s2704_s17 }
 0xa06   : > { %v2041_v29 = vpop.permute.xlu2 %2040 }
 0xa07   : > { %v2126_v62 = vsel %vm1896_vm12, %v1918_v56, %v2041_v29  ;;  %v2134_v56 = vsel %vm1896_vm12, %v1932_v34, %v2057_v50  ;;  %v2067_v33 = vpop.permute.xlu1 %2066 }
 0xa08   : > { %2199 = vst [vmem:[#allocation1 + $0x2] ss:$4 sm:$0xff] %v2126_v62  ;;  %v2139_v34 = vsel %vm1896_vm12, %v1941_v11, %v2067_v33 }
 0xa0e   : > { %v2043_v54 = vpop.permute.xlu2 %2042 }
 0xa0f   : > { %v2127_v23 = vsel %vm1896_vm12, %v1920_v21, %v2043_v54  ;;  %v2073_v11 = vpop.permute.xlu1 %2072 }
 0xa10   : > { %2200 = vst [vmem:[#allocation1 + $0x3] ss:$4 sm:$0xff] %v2127_v23 }
 0xa16   : > { %v2047_v19 = vpop.permute.xlu2 %2046 }
 0xa17   : > { %v2129_v39 = vsel %vm1896_vm12, %v1923_v18, %v2047_v19  ;;  %v2205_v57 = vld.sshfl [vmem:[#allocation1] sm:$0xff pattern:$0x73625140] }
 0xa18   : > { %2202 = vst [vmem:[#allocation1 + $0x21] ss:$4 sm:$0xff] %v2129_v39 }
 0xa19   : > { %2207 = vst [vmem:[#allocation1] ss:$4 sm:$0xff] %v2132_v16 }
 0xa1a   : > { %2209 = vst [vmem:[#allocation1 + $0x2] ss:$4 sm:$0xff] %v2134_v56 }
 0xa1e   : > { %v2049_v8 = vpop.permute.xlu2 %2048 }
 0xa1f   : > { %v2130_v21 = vsel %vm1896_vm12, %v1925_v17, %v2049_v8 }
 0xa20   : > { %2203 = vst [vmem:[#allocation1 + $0x22] ss:$4 sm:$0xff] %v2130_v21 }
 0xa26   : > { %v2051_v63 = vpop.permute.xlu2 %2050 }
 0xa27   : > { %v2131_v18 = vsel %vm1896_vm12, %v1927_v61, %v2051_v63  ;;  %v2137_v61 = vsel %vm1896_vm12, %v1937_v36, %v2063_v15  ;;  %v2142_v36 = vsel %vm1896_vm12, %v1946_v45, %v2073_v11  ;;  %v2144_v45 = vsel %vm1896_vm12, %v3628_v32, %v3721_v0 }
 0xa28   : > { %2204 = vst [vmem:[#allocation1 + $0x23] ss:$4 sm:$0xff] %v2131_v18 }
 0xa2e   : > { %v2055_v20 = vpop.permute.xlu2 %2054 }
 0xa2f   : > { %v2206_v40 = vld.sshfl [vmem:[#allocation1 + $0x20] sm:$0xff pattern:$0x73625140]  ;;  %v2133_v17 = vsel %vm1896_vm12, %v1930_v7, %v2055_v20 }
 0xa30   : > { %2214 = vst [vmem:[#allocation1 + $0x23] ss:$4 sm:$0xff] %v2139_v34  ;;  %v2236_v27 = vpack.c.bf16 %v2206_v40, %v2205_v57 }
 0xa31   : > { %2211 = vst [vmem:[#allocation1 + $0x20] ss:$4 sm:$0xff] %v2136_v49 }
 0xa32   : > { %2212 = vst [vmem:[#allocation1 + $0x21] ss:$4 sm:$0xff] %v2137_v61  ;;  %2498 = vmatmul.msk.bf16.gmra.mxu0 %vm486_vm0, %v2236_v27 }
 0xa33   : > { %2208 = vst [vmem:[#allocation1 + $0x1] ss:$4 sm:$0xff] %v2133_v17 }
 0xa36   : > { %v2059_v42 = vpop.permute.xlu2 %2058 }
 0xa37   : > { %v2135_v30 = vsel %vm1896_vm12, %v1934_v43, %v2059_v42  ;;  %v2079_v43 = vpop.permute.xlu1 %2078 }
 0xa38   : > { %2210 = vst [vmem:[#allocation1 + $0x3] ss:$4 sm:$0xff] %v2135_v30  ;;  %v2145_v10 = vsel %vm1896_vm12, %v1951_v47, %v2079_v43 }
 0xa3e   : > { %v2065_v38 = vpop.permute.xlu2 %2064 }
 0xa3f   : > { %v2138_v14 = vsel %vm1896_vm12, %v1939_v25, %v2065_v38  ;;  %v2215_v7 = vld.sshfl [vmem:[#allocation1] sm:$0xff pattern:$0x73625140]  ;;  %v2317_v47 = vpop.permute.xlu1 %2316 }
 0xa40   : > { %2213 = vst [vmem:[#allocation1 + $0x22] ss:$4 sm:$0xff] %v2138_v14 }
 0xa41   : > { %2219 = vst [vmem:[#allocation1 + $0x2] ss:$4 sm:$0xff] %v2142_v36 }
 0xa42   : > { %2217 = vst [vmem:[#allocation1] ss:$4 sm:$0xff] %v2140_v28 }
 0xa43   : > { %2220 = vst [vmem:[#allocation1 + $0x3] ss:$4 sm:$0xff] %v2143_v52 }
 0xa46   : > { %v2071_v26 = vpop.permute.xlu2 %2070 }
 0xa47   : > { %v2141_v41 = vsel %vm1896_vm12, %v1944_v3, %v2071_v26  ;;  %v2216_v25 = vld.sshfl [vmem:[#allocation1 + $0x20] sm:$0xff pattern:$0x73625140]  ;;  %v2323_v59 = vpop.permute.xlu1 %2322 }
 0xa48   : > { %2218 = vst [vmem:[#allocation1 + $0x1] ss:$4 sm:$0xff] %v2141_v41  ;;  %v2237_v6 = vpack.c.bf16 %v2216_v25, %v2215_v7 }
 0xa49   : > { %2221 = vst [vmem:[#allocation1 + $0x20] ss:$4 sm:$0xff] %v2144_v45 }
 0xa4a   : > { %2222 = vst [vmem:[#allocation1 + $0x21] ss:$4 sm:$0xff] %v2145_v10  ;;  %2499 = vmatmul.msk.bf16.gmra.mxu0 %vm486_vm0, %v2237_v6 }
 0xa4b   : > { %2223 = vst [vmem:[#allocation1 + $0x22] ss:$4 sm:$0xff] %v2146_v9 }
 0xa4e   : > { %v2083_v46 = vpop.permute.xlu2 %2082 }
 0xa4f   : > { %v2147_v32 = vsel %vm1896_vm12, %v1955_v44, %v2083_v46  ;;  %v2225_v24 = vld.sshfl [vmem:[#allocation1] sm:$0xff pattern:$0x73625140]  ;;  %v2319_v44 = vpop.permute.xlu0 %2318  ;;  %v2329_v19 = vpop.permute.xlu1 %2328 }
 0xa50   : > { %2224 = vst [vmem:[#allocation1 + $0x23] ss:$4 sm:$0xff] %v2147_v32 }
 0xa56   : > { %v2321_v48 = vpop.permute.xlu2 %2320 }
 0xa57   : > { %v2226_v3 = vld.sshfl [vmem:[#allocation1 + $0x20] sm:$0xff pattern:$0x73625140]  ;;  %v2325_v29 = vpop.permute.xlu0 %2324 }
 0xa58   : > { %v2238_v35 = vpack.c.bf16 %v2226_v3, %v2225_v24 }
 0xa5a   : > { %2500 = vmatmul.msk.bf16.gmra.mxu0 %vm486_vm0, %v2238_v35 }
 0xa5e   : > { %v2327_v54 = vpop.permute.xlu2 %2326 }
 0xa5f   : > { %v2331_v16 = vpop.permute.xlu0 %2330 }
 0xa7f   : > { %v2280_v37 = vpop.f32.mrf.mxu0 }
 0xa80   : > { %v2281_v51 = vadd.f32 %v2540_v60, %v2280_v37 }
 0xa82   : > { %2300 = vst.msk [vmem:[%s3810_s29] sm:$0xff] %vm1057_vm10, %v2281_v51 }
 0xa83   : > { %2341 = vst.msk [vmem:[%s3810_s29] sm:$0xff] %vm2340_vm1, %v2317_v47 }
 0xa87   : > { %v2282_v22 = vpop.f32.mrf.mxu0 }
 0xa88   : > { %v2283_v0 = vadd.f32 %v2540_v60, %v2282_v22 }
 0xa8a   : > { %2301 = vst.msk [vmem:[%s3810_s29 + $0x8] sm:$0xff] %vm1057_vm10, %v2283_v0 }
 0xa8b   : > { %2342 = vst.msk [vmem:[%s3810_s29 + $0x8] sm:$0xff] %vm2340_vm1, %v2319_v44 }
 0xaaf   : > { %v2285_v4 = vpop.f32.mrf.mxu0 }
 0xab0   : > { %v2286_v5 = vadd.f32 %v2540_v60, %v2285_v4 }
 0xab2   : > { %2302 = vst.msk [vmem:[%s3810_s29 + $0x10] sm:$0xff] %vm1057_vm10, %v2286_v5 }
 0xab3   : > { %2343 = vst.msk [vmem:[%s3810_s29 + $0x10] sm:$0xff] %vm2340_vm1, %v2321_v48 }
 0xab7   : > { %v2287_v13 = vpop.f32.mrf.mxu0 }
 0xab8   : > { %v2288_v12 = vadd.f32 %v2540_v60, %v2287_v13 }
 0xaba   : > { %2303 = vst.msk [vmem:[%s3810_s29 + $0x18] sm:$0xff] %vm1057_vm10, %v2288_v12 }
 0xabb   : > { %2344 = vst.msk [vmem:[%s3810_s29 + $0x18] sm:$0xff] %vm2340_vm1, %v2323_v59 }
 0xac7   : > { %v2290_v1 = vpop.f32.mrf.mxu0 }
 0xac8   : > { %v2291_v53 = vadd.f32 %v2540_v60, %v2290_v1 }
 0xaca   : > { %2304 = vst.msk [vmem:[%s3810_s29 + $0x20] sm:$0xff] %vm1057_vm10, %v2291_v53 }
 0xacb   : > { %2345 = vst.msk [vmem:[%s3810_s29 + $0x20] sm:$0xff] %vm2340_vm1, %v2325_v29 }
 0xacf   : > { %v2292_v62 = vpop.f32.mrf.mxu0 }
 0xad0   : > { %v2293_v2 = vadd.f32 %v2540_v60, %v2292_v62 }
 0xad2   : > { %2305 = vst.msk [vmem:[%s3810_s29 + $0x28] sm:$0xff] %vm1057_vm10, %v2293_v2 }
 0xad3   : > { %2346 = vst.msk [vmem:[%s3810_s29 + $0x28] sm:$0xff] %vm2340_vm1, %v2327_v54 }
 0xad7   : > { %v2295_v23 = vpop.f32.mrf.mxu0 }
 0xad8   : > { %v2296_v50 = vadd.f32 %v2540_v60, %v2295_v23 }
 0xada   : > { %2306 = vst.msk [vmem:[%s3810_s29 + $0x30] sm:$0xff] %vm1057_vm10, %v2296_v50 }
 0xadb   : > { %2347 = vst.msk [vmem:[%s3810_s29 + $0x30] sm:$0xff] %vm2340_vm1, %v2329_v19 }
 0xadf   : > { %v2297_v39 = vpop.f32.mrf.mxu0 }
 0xae0   : > { %v2298_v57 = vadd.f32 %v2540_v60, %v2297_v39 }
 0xae2   : > { %2307 = vst.msk [vmem:[%s3810_s29 + $0x38] sm:$0xff] %vm1057_vm10, %v2298_v57 }
 0xae3   : > { %2348 = vst.msk [vmem:[%s3810_s29 + $0x38] sm:$0xff] %vm2340_vm1, %v2331_v16 }
 0xae4 PF: > { %s23_s25 = sadd.s32 1, %s2695_s25  }
 0xae5   : > { %p20_p4 = scmp.ge.s32.totalorder %s23_s25, 4  }
 0xae7   :  { %22 = sbr.rel (!%p20_p4) target bundleno = 1 (0x1), region = 109 }

</bundles_post_ra>
